<compile_context>
chip_gen: v7x
topology: tpu7x:2x2x1
jax: 0.10.0
libtpu: 0.0.40
codegen_flags: <defaults>
</compile_context>

<pallas_src>
import numpy as np
import jax
import jax.numpy as jnp
from jax.experimental import pallas as pl
from jax.experimental.pallas import tpu as pltpu


# -----------------------------------------------------------------------------
# Single fused kernel: 2-layer LSTM over both streams + folded MHA/FC epilogue.
# -----------------------------------------------------------------------------
def _fused_forward_kernel(x_ref, wih1_ref, whh1_ref, b1_ref,
                          wih2_ref, whh2_ref, b2_ref,
                          h0_ref, c0_ref, wpost_ref, bpost_ref,
                          out_ref, xp1_ref, h1all_ref, xp2_ref):
    TB, D = x_ref.shape                 # x is time-major, flattened (T*2B, D)
    _, B2, H = h0_ref.shape             # B2 = 2B  (head rows ++ body rows)
    T = TB // B2
    B = B2 // 2

    def lstm_cell(xp_t, h, c, whh):
        # Recurrent half only: gates = x_proj_t + h @ W_hh   (bias already in xp)
        gates = xp_t + jnp.dot(h, whh, preferred_element_type=jnp.float32)
        sg = jax.nn.sigmoid(gates)              # one full-width EUP pass
        g = jnp.tanh(gates[:, 2 * H:3 * H])     # tanh only on the g quarter
        i = sg[:, 0 * H:1 * H]                  # PyTorch gate order: i, f, g, o
        f = sg[:, 1 * H:2 * H]
        o = sg[:, 3 * H:4 * H]
        c_new = f * c + i * g
        h_new = o * jnp.tanh(c_new)
        return h_new, c_new

    # ---- Layer 1: batched input projection (bias folded in), one big matmul.
    xp1_ref[...] = (jnp.dot(x_ref[...], wih1_ref[...],
                            preferred_element_type=jnp.float32) + b1_ref[...])

    whh1 = whh1_ref[...]                 # (H, 4H) stays hot across the loop
    h1 = h0_ref[0]
    c1 = c0_ref[0]
    # Time loop fully unrolled at trace time (T static & small); per-step
    # slices are static and sublane-aligned (2B is a multiple of 8).
    for t in range(T):
        lo, hi = t * B2, (t + 1) * B2
        h1, c1 = lstm_cell(xp1_ref[lo:hi, :], h1, c1, whh1)
        h1all_ref[lo:hi, :] = h1         # stash h1_t for the batched L2 proj

    # ---- Layer 2: batched input projection of all h1_t, one big matmul.
    xp2_ref[...] = (jnp.dot(h1all_ref[...], wih2_ref[...],
                            preferred_element_type=jnp.float32) + b2_ref[...])

    whh2 = whh2_ref[...]
    h2 = h0_ref[1]
    c2 = c0_ref[1]
    for t in range(T):
        lo, hi = t * B2, (t + 1) * B2
        h2, c2 = lstm_cell(xp2_ref[lo:hi, :], h2, c2, whh2)

    # ---- Epilogue.  MHA with a length-1 key axis: softmax == 1 exactly, so
    # the attention output is the V projection of the head stream;
    # V -> out_proj -> fc is an affine chain pre-folded into (wpost, bpost).
    h_head = h2[:B]                      # rows [0, B) carry the head stream
    out_ref[...] = (jnp.dot(h_head, wpost_ref[...],
                            preferred_element_type=jnp.float32)
                    + bpost_ref[...])


def forward(head, body, h0_head, c0_head, h0_body, c0_body, kernel_params):
    """head/body: (B, T, D) batch-first. Returns (B, 3)."""
    wih1, whh1, b1, wih2, whh2, b2, w_post, b_post = kernel_params
    B, T, D = head.shape
    H = whh1.shape[0]
    B2 = 2 * B

    # head & body share LSTM weights -> batch-concat, go time-major and
    # flatten to (T*2B, D) so the per-timestep slab is a contiguous,
    # sublane-aligned row range and the layer-1 input projection is one
    # well-shaped (T*2B, D) @ (D, 4H) matmul.
    x = jnp.concatenate([head, body], axis=0)                       # (2B, T, D)
    x_tm = jnp.transpose(x, (1, 0, 2)).reshape(T * B2, D)           # (T*2B, D)
    h0 = jnp.concatenate([h0_head, h0_body], axis=1)                # (2, 2B, H)
    c0 = jnp.concatenate([c0_head, c0_body], axis=1)                # (2, 2B, H)

    return pl.pallas_call(
        _fused_forward_kernel,
        out_shape=jax.ShapeDtypeStruct((B, w_post.shape[1]), jnp.float32),
        scratch_shapes=[
            pltpu.VMEM((T * B2, 4 * H), jnp.float32),   # x_proj layer 1
            pltpu.VMEM((T * B2, H), jnp.float32),       # all h1_t (layer-2 input)
            pltpu.VMEM((T * B2, 4 * H), jnp.float32),   # x_proj layer 2
        ],
    )(x_tm, wih1, whh1, b1, wih2, whh2, b2, h0, c0, w_post, b_post)


# -----------------------------------------------------------------------------
# Parameter init (PyTorch shapes) and offline packing to kernel orientation.
# -----------------------------------------------------------------------------
def init_torch_params(key, dimension, hidd_dim):
    H = hidd_dim
    ks = jax.random.split(key, 14)

    def w(k, shape, scale=0.1):
        return jax.random.normal(k, shape, jnp.float32) * scale

    return dict(
        w_ih_l0=w(ks[0], (4 * H, dimension)),
        w_hh_l0=w(ks[1], (4 * H, H)),
        b_ih_l0=w(ks[2], (4 * H,)),
        b_hh_l0=w(ks[3], (4 * H,)),
        w_ih_l1=w(ks[4], (4 * H, H)),
        w_hh_l1=w(ks[5], (4 * H, H)),
        b_ih_l1=w(ks[6], (4 * H,)),
        b_hh_l1=w(ks[7], (4 * H,)),
        in_proj_w=w(ks[8], (3 * H, H)),    # kdim == vdim == embed_dim == H
        in_proj_b=w(ks[9], (3 * H,)),
        out_proj_w=w(ks[10], (H, H)),
        out_proj_b=w(ks[11], (H,)),
        fc_w=w(ks[12], (3, H)),
        fc_b=w(ks[13], (3,)),
    )


def pack_kernel_params(p):
    H = p["w_hh_l0"].shape[1]
    # Per-layer weights in matmul orientation; biases summed (b_ih + b_hh) and
    # folded into the batched input projections.
    wih1 = p["w_ih_l0"].T                                  # (D, 4H)
    whh1 = p["w_hh_l0"].T                                  # (H, 4H)
    b1 = (p["b_ih_l0"] + p["b_hh_l0"]).reshape(1, 4 * H)
    wih2 = p["w_ih_l1"].T                                  # (H, 4H)
    whh2 = p["w_hh_l1"].T                                  # (H, 4H)
    b2 = (p["b_ih_l1"] + p["b_hh_l1"]).reshape(1, 4 * H)
    # Post-LSTM path (softmax over 1 key == 1):
    #   out = ((h_head @ Wv + bv) @ Wo + bo) @ Wfc + bfc  ->  h_head @ W_post + b_post
    wv = p["in_proj_w"][2 * H:3 * H].T            # (H, H)
    bv = p["in_proj_b"][2 * H:3 * H].reshape(1, H)
    wo = p["out_proj_w"].T
    bo = p["out_proj_b"].reshape(1, H)
    wfc = p["fc_w"].T                             # (H, 3)
    bfc = p["fc_b"].reshape(1, 3)
    w_post = wv @ wo @ wfc                        # (H, 3)
    b_post = bv @ wo @ wfc + bo @ wfc + bfc       # (1, 3)
    return wih1, whh1, b1, wih2, whh2, b2, w_post, b_post


# -----------------------------------------------------------------------------
# Pure-JAX reference (full, un-fused math incl. the length-1 softmax).
# -----------------------------------------------------------------------------
def _lstm_ref(x, h0, c0, p):
    H = p["w_hh_l0"].shape[1]

    def cell(x_t, h, c, w_ih, w_hh, b_ih, b_hh):
        g = x_t @ w_ih.T + h @ w_hh.T + b_ih + b_hh
        i = jax.nn.sigmoid(g[:, :H])
        f = jax.nn.sigmoid(g[:, H:2 * H])
        gg = jnp.tanh(g[:, 2 * H:3 * H])
        o = jax.nn.sigmoid(g[:, 3 * H:])
        c_n = f * c + i * gg
        return o * jnp.tanh(c_n), c_n

    def step(carry, x_t):
        h1, c1, h2, c2 = carry
        h1, c1 = cell(x_t, h1, c1, p["w_ih_l0"], p["w_hh_l0"],
                      p["b_ih_l0"], p["b_hh_l0"])
        h2, c2 = cell(h1, h2, c2, p["w_ih_l1"], p["w_hh_l1"],
                      p["b_ih_l1"], p["b_hh_l1"])
        return (h1, c1, h2, c2), None

    (h1, c1, h2, c2), _ = jax.lax.scan(step, (h0[0], c0[0], h0[1], c0[1]),
                                       jnp.transpose(x, (1, 0, 2)))
    return h2


def forward_ref(head, body, h0_head, c0_head, h0_body, c0_body, p):
    B = head.shape[0]
    H = p["w_hh_l0"].shape[1]
    n_heads = 2
    hd = H // n_heads
    h = _lstm_ref(head, h0_head, c0_head, p)   # final_hidden_state_head[-1]
    b = _lstm_ref(body, h0_body, c0_body, p)   # final_hidden_state_body[-1]
    # MultiheadAttention(query=b, key=b, value=h), batch_first, seq length 1
    q = b @ p["in_proj_w"][0:H].T + p["in_proj_b"][0:H]
    k = b @ p["in_proj_w"][H:2 * H].T + p["in_proj_b"][H:2 * H]
    v = h @ p["in_proj_w"][2 * H:3 * H].T + p["in_proj_b"][2 * H:3 * H]
    qh = q.reshape(B, n_heads, hd)
    kh = k.reshape(B, n_heads, hd)
    vh = v.reshape(B, n_heads, hd)
    scores = jnp.sum(qh * kh, axis=-1, keepdims=True) / jnp.sqrt(float(hd))
    attn_w = jax.nn.softmax(scores, axis=-1)    # length-1 key axis -> all ones
    attn = (attn_w * vh).reshape(B, H)
    o = attn @ p["out_proj_w"].T + p["out_proj_b"]
    return o @ p["fc_w"].T + p["fc_b"]


# -----------------------------------------------------------------------------
if __name__ == "__main__":
    B, T, D, H = 8, 8, 16, 32   # batch, seq, `dimension`, `hidd_dim`

    key = jax.random.PRNGKey(0)
    (k_params, k_head, k_body,
     k_h0h, k_c0h, k_h0b, k_c0b) = jax.random.split(key, 7)

    torch_params = init_torch_params(k_params, D, H)
    kernel_params = pack_kernel_params(torch_params)

    head = jax.random.normal(k_head, (B, T, D), jnp.float32)
    body = jax.random.normal(k_body, (B, T, D), jnp.float32)
    # deterministic stand-ins for the torch.rand initial states built in forward()
    h0_head = jax.random.uniform(k_h0h, (2, B, H), jnp.float32)
    c0_head = jax.random.uniform(k_c0h, (2, B, H), jnp.float32)
    h0_body = jax.random.uniform(k_h0b, (2, B, H), jnp.float32)
    c0_body = jax.random.uniform(k_c0b, (2, B, H), jnp.float32)

    out = jax.block_until_ready(
        forward(head, body, h0_head, c0_head, h0_body, c0_body, kernel_params))
    assert out.shape == (B, 3) and out.dtype == jnp.float32

    ref = jax.block_until_ready(
        forward_ref(head, body, h0_head, c0_head, h0_body, c0_body, torch_params))
    np.testing.assert_allclose(np.asarray(out), np.asarray(ref),
                               rtol=2e-3, atol=2e-3)
    print("KERNEL_OK")
</pallas_src>

<mosaic_0001>
module attributes {stable_mosaic.version = 11 : i64} {
  func.func @_fused_forward_kernel(%arg0: memref<128x16xf32, #tpu.memory_space<vmem>>, %arg1: memref<16x128xf32, #tpu.memory_space<vmem>>, %arg2: memref<32x128xf32, #tpu.memory_space<vmem>>, %arg3: memref<1x128xf32, #tpu.memory_space<vmem>>, %arg4: memref<32x128xf32, #tpu.memory_space<vmem>>, %arg5: memref<32x128xf32, #tpu.memory_space<vmem>>, %arg6: memref<1x128xf32, #tpu.memory_space<vmem>>, %arg7: memref<2x16x32xf32, #tpu.memory_space<vmem>>, %arg8: memref<2x16x32xf32, #tpu.memory_space<vmem>>, %arg9: memref<32x3xf32, #tpu.memory_space<vmem>>, %arg10: memref<1x3xf32, #tpu.memory_space<vmem>>, %arg11: memref<8x3xf32, #tpu.memory_space<vmem>>, %arg12: memref<128x128xf32, #tpu.memory_space<vmem>>, %arg13: memref<128x32xf32, #tpu.memory_space<vmem>>, %arg14: memref<128x128xf32, #tpu.memory_space<vmem>>) attributes {dimension_semantics = [], scalar_prefetch = 0 : i64, scratch_operands = 3 : i64, tpu.core_type = #tpu.core_type<tc>} {
    %c0 = arith.constant 0 : index
    %c0_0 = arith.constant 0 : index
    %0 = vector.load %arg0[%c0, %c0_0] : memref<128x16xf32, #tpu.memory_space<vmem>>, vector<128x16xf32>
    %c0_1 = arith.constant 0 : index
    %c0_2 = arith.constant 0 : index
    %1 = vector.load %arg1[%c0_1, %c0_2] : memref<16x128xf32, #tpu.memory_space<vmem>>, vector<16x128xf32>
    %cst = arith.constant dense<0.000000e+00> : vector<128x128xf32>
    %2 = tpu.matmul %0, %1, %cst {dimension_numbers = #tpu.dot_dimension_numbers<[1], [0], [0], [1], [0, 0, 1, 1], [], []>} : vector<128x16xf32>, vector<16x128xf32>, vector<128x128xf32> -> vector<128x128xf32>
    %c0_3 = arith.constant 0 : index
    %c0_4 = arith.constant 0 : index
    %3 = vector.load %arg3[%c0_3, %c0_4] : memref<1x128xf32, #tpu.memory_space<vmem>>, vector<1x128xf32>
    %4 = vector.broadcast %3 : vector<1x128xf32> to vector<128x128xf32>
    %5 = arith.addf %2, %4 : vector<128x128xf32>
    %c0_5 = arith.constant 0 : index
    %c0_6 = arith.constant 0 : index
    %6 = vector.load %arg12[%c0_5, %c0_6] : memref<128x128xf32, #tpu.memory_space<vmem>>, vector<128x128xf32>
    tpu.vector_store %arg12[%c0_5, %c0_6], %5 {strides = array<i32>} : memref<128x128xf32, #tpu.memory_space<vmem>>, vector<128x128xf32>,
    %c0_7 = arith.constant 0 : index
    %c0_8 = arith.constant 0 : index
    %7 = vector.load %arg2[%c0_7, %c0_8] : memref<32x128xf32, #tpu.memory_space<vmem>>, vector<32x128xf32>
    %c0_9 = arith.constant 0 : index
    %c0_10 = arith.constant 0 : index
    %c0_11 = arith.constant 0 : index
    %8 = vector.load %arg7[%c0_9, %c0_10, %c0_11] : memref<2x16x32xf32, #tpu.memory_space<vmem>>, vector<1x16x32xf32>
    %9 = vector.shape_cast %8 : vector<1x16x32xf32> to vector<16x32xf32>
    %c0_12 = arith.constant 0 : index
    %c0_13 = arith.constant 0 : index
    %c0_14 = arith.constant 0 : index
    %10 = vector.load %arg8[%c0_12, %c0_13, %c0_14] : memref<2x16x32xf32, #tpu.memory_space<vmem>>, vector<1x16x32xf32>
    %11 = vector.shape_cast %10 : vector<1x16x32xf32> to vector<16x32xf32>
    %c0_15 = arith.constant 0 : index
    %c0_16 = arith.constant 0 : index
    %12 = vector.load %arg12[%c0_15, %c0_16] : memref<128x128xf32, #tpu.memory_space<vmem>>, vector<16x128xf32>
    %cst_17 = arith.constant dense<0.000000e+00> : vector<16x128xf32>
    %13 = tpu.matmul %9, %7, %cst_17 {dimension_numbers = #tpu.dot_dimension_numbers<[1], [0], [0], [1], [0, 0, 1, 1], [], []>} : vector<16x32xf32>, vector<32x128xf32>, vector<16x128xf32> -> vector<16x128xf32>
    %14 = arith.addf %12, %13 : vector<16x128xf32>
    %15 = arith.negf %14 : vector<16x128xf32>
    %16 = math.exp %15 : vector<16x128xf32>
    %cst_18 = arith.constant 1.000000e+00 : f32
    %17 = vector.broadcast %cst_18 : f32 to vector<16x128xf32>
    %18 = arith.addf %17, %16 : vector<16x128xf32>
    %19 = arith.divf %17, %18 : vector<16x128xf32>
    %20 = vector.extract_strided_slice %14 {offsets = [0, 64], sizes = [16, 32], strides = [1, 1]} : vector<16x128xf32> to vector<16x32xf32>
    %21 = math.tanh %20 : vector<16x32xf32>
    %22 = vector.extract_strided_slice %19 {offsets = [0, 0], sizes = [16, 32], strides = [1, 1]} : vector<16x128xf32> to vector<16x32xf32>
    %23 = vector.extract_strided_slice %19 {offsets = [0, 32], sizes = [16, 32], strides = [1, 1]} : vector<16x128xf32> to vector<16x32xf32>
    %24 = vector.extract_strided_slice %19 {offsets = [0, 96], sizes = [16, 32], strides = [1, 1]} : vector<16x128xf32> to vector<16x32xf32>
    %25 = arith.mulf %23, %11 : vector<16x32xf32>
    %26 = arith.mulf %22, %21 : vector<16x32xf32>
    %27 = arith.addf %25, %26 : vector<16x32xf32>
    %28 = math.tanh %27 : vector<16x32xf32>
    %29 = arith.mulf %24, %28 : vector<16x32xf32>
    %c0_19 = arith.constant 0 : index
    %c0_20 = arith.constant 0 : index
    %30 = vector.load %arg13[%c0_19, %c0_20] : memref<128x32xf32, #tpu.memory_space<vmem>>, vector<16x32xf32>
    tpu.vector_store %arg13[%c0_19, %c0_20], %29 {strides = array<i32>} : memref<128x32xf32, #tpu.memory_space<vmem>>, vector<16x32xf32>,
    %c16 = arith.constant 16 : index
    %c0_21 = arith.constant 0 : index
    %31 = vector.load %arg12[%c16, %c0_21] : memref<128x128xf32, #tpu.memory_space<vmem>>, vector<16x128xf32>
    %cst_22 = arith.constant dense<0.000000e+00> : vector<16x128xf32>
    %32 = tpu.matmul %29, %7, %cst_22 {dimension_numbers = #tpu.dot_dimension_numbers<[1], [0], [0], [1], [0, 0, 1, 1], [], []>} : vector<16x32xf32>, vector<32x128xf32>, vector<16x128xf32> -> vector<16x128xf32>
    %33 = arith.addf %31, %32 : vector<16x128xf32>
    %34 = arith.negf %33 : vector<16x128xf32>
    %35 = math.exp %34 : vector<16x128xf32>
    %cst_23 = arith.constant 1.000000e+00 : f32
    %36 = vector.broadcast %cst_23 : f32 to vector<16x128xf32>
    %37 = arith.addf %36, %35 : vector<16x128xf32>
    %38 = arith.divf %36, %37 : vector<16x128xf32>
    %39 = vector.extract_strided_slice %33 {offsets = [0, 64], sizes = [16, 32], strides = [1, 1]} : vector<16x128xf32> to vector<16x32xf32>
    %40 = math.tanh %39 : vector<16x32xf32>
    %41 = vector.extract_strided_slice %38 {offsets = [0, 0], sizes = [16, 32], strides = [1, 1]} : vector<16x128xf32> to vector<16x32xf32>
    %42 = vector.extract_strided_slice %38 {offsets = [0, 32], sizes = [16, 32], strides = [1, 1]} : vector<16x128xf32> to vector<16x32xf32>
    %43 = vector.extract_strided_slice %38 {offsets = [0, 96], sizes = [16, 32], strides = [1, 1]} : vector<16x128xf32> to vector<16x32xf32>
    %44 = arith.mulf %42, %27 : vector<16x32xf32>
    %45 = arith.mulf %41, %40 : vector<16x32xf32>
    %46 = arith.addf %44, %45 : vector<16x32xf32>
    %47 = math.tanh %46 : vector<16x32xf32>
    %48 = arith.mulf %43, %47 : vector<16x32xf32>
    %c16_24 = arith.constant 16 : index
    %c0_25 = arith.constant 0 : index
    %49 = vector.load %arg13[%c16_24, %c0_25] : memref<128x32xf32, #tpu.memory_space<vmem>>, vector<16x32xf32>
    tpu.vector_store %arg13[%c16_24, %c0_25], %48 {strides = array<i32>} : memref<128x32xf32, #tpu.memory_space<vmem>>, vector<16x32xf32>,
    %c32 = arith.constant 32 : index
    %c0_26 = arith.constant 0 : index
    %50 = vector.load %arg12[%c32, %c0_26] : memref<128x128xf32, #tpu.memory_space<vmem>>, vector<16x128xf32>
    %cst_27 = arith.constant dense<0.000000e+00> : vector<16x128xf32>
    %51 = tpu.matmul %48, %7, %cst_27 {dimension_numbers = #tpu.dot_dimension_numbers<[1], [0], [0], [1], [0, 0, 1, 1], [], []>} : vector<16x32xf32>, vector<32x128xf32>, vector<16x128xf32> -> vector<16x128xf32>
    %52 = arith.addf %50, %51 : vector<16x128xf32>
    %53 = arith.negf %52 : vector<16x128xf32>
    %54 = math.exp %53 : vector<16x128xf32>
    %cst_28 = arith.constant 1.000000e+00 : f32
    %55 = vector.broadcast %cst_28 : f32 to vector<16x128xf32>
    %56 = arith.addf %55, %54 : vector<16x128xf32>
    %57 = arith.divf %55, %56 : vector<16x128xf32>
    %58 = vector.extract_strided_slice %52 {offsets = [0, 64], sizes = [16, 32], strides = [1, 1]} : vector<16x128xf32> to vector<16x32xf32>
    %59 = math.tanh %58 : vector<16x32xf32>
    %60 = vector.extract_strided_slice %57 {offsets = [0, 0], sizes = [16, 32], strides = [1, 1]} : vector<16x128xf32> to vector<16x32xf32>
    %61 = vector.extract_strided_slice %57 {offsets = [0, 32], sizes = [16, 32], strides = [1, 1]} : vector<16x128xf32> to vector<16x32xf32>
    %62 = vector.extract_strided_slice %57 {offsets = [0, 96], sizes = [16, 32], strides = [1, 1]} : vector<16x128xf32> to vector<16x32xf32>
    %63 = arith.mulf %61, %46 : vector<16x32xf32>
    %64 = arith.mulf %60, %59 : vector<16x32xf32>
    %65 = arith.addf %63, %64 : vector<16x32xf32>
    %66 = math.tanh %65 : vector<16x32xf32>
    %67 = arith.mulf %62, %66 : vector<16x32xf32>
    %c32_29 = arith.constant 32 : index
    %c0_30 = arith.constant 0 : index
    %68 = vector.load %arg13[%c32_29, %c0_30] : memref<128x32xf32, #tpu.memory_space<vmem>>, vector<16x32xf32>
    tpu.vector_store %arg13[%c32_29, %c0_30], %67 {strides = array<i32>} : memref<128x32xf32, #tpu.memory_space<vmem>>, vector<16x32xf32>,
    %c48 = arith.constant 48 : index
    %c0_31 = arith.constant 0 : index
    %69 = vector.load %arg12[%c48, %c0_31] : memref<128x128xf32, #tpu.memory_space<vmem>>, vector<16x128xf32>
    %cst_32 = arith.constant dense<0.000000e+00> : vector<16x128xf32>
    %70 = tpu.matmul %67, %7, %cst_32 {dimension_numbers = #tpu.dot_dimension_numbers<[1], [0], [0], [1], [0, 0, 1, 1], [], []>} : vector<16x32xf32>, vector<32x128xf32>, vector<16x128xf32> -> vector<16x128xf32>
    %71 = arith.addf %69, %70 : vector<16x128xf32>
    %72 = arith.negf %71 : vector<16x128xf32>
    %73 = math.exp %72 : vector<16x128xf32>
    %cst_33 = arith.constant 1.000000e+00 : f32
    %74 = vector.broadcast %cst_33 : f32 to vector<16x128xf32>
    %75 = arith.addf %74, %73 : vector<16x128xf32>
    %76 = arith.divf %74, %75 : vector<16x128xf32>
    %77 = vector.extract_strided_slice %71 {offsets = [0, 64], sizes = [16, 32], strides = [1, 1]} : vector<16x128xf32> to vector<16x32xf32>
    %78 = math.tanh %77 : vector<16x32xf32>
    %79 = vector.extract_strided_slice %76 {offsets = [0, 0], sizes = [16, 32], strides = [1, 1]} : vector<16x128xf32> to vector<16x32xf32>
    %80 = vector.extract_strided_slice %76 {offsets = [0, 32], sizes = [16, 32], strides = [1, 1]} : vector<16x128xf32> to vector<16x32xf32>
    %81 = vector.extract_strided_slice %76 {offsets = [0, 96], sizes = [16, 32], strides = [1, 1]} : vector<16x128xf32> to vector<16x32xf32>
    %82 = arith.mulf %80, %65 : vector<16x32xf32>
    %83 = arith.mulf %79, %78 : vector<16x32xf32>
    %84 = arith.addf %82, %83 : vector<16x32xf32>
    %85 = math.tanh %84 : vector<16x32xf32>
    %86 = arith.mulf %81, %85 : vector<16x32xf32>
    %c48_34 = arith.constant 48 : index
    %c0_35 = arith.constant 0 : index
    %87 = vector.load %arg13[%c48_34, %c0_35] : memref<128x32xf32, #tpu.memory_space<vmem>>, vector<16x32xf32>
    tpu.vector_store %arg13[%c48_34, %c0_35], %86 {strides = array<i32>} : memref<128x32xf32, #tpu.memory_space<vmem>>, vector<16x32xf32>,
    %c64 = arith.constant 64 : index
    %c0_36 = arith.constant 0 : index
    %88 = vector.load %arg12[%c64, %c0_36] : memref<128x128xf32, #tpu.memory_space<vmem>>, vector<16x128xf32>
    %cst_37 = arith.constant dense<0.000000e+00> : vector<16x128xf32>
    %89 = tpu.matmul %86, %7, %cst_37 {dimension_numbers = #tpu.dot_dimension_numbers<[1], [0], [0], [1], [0, 0, 1, 1], [], []>} : vector<16x32xf32>, vector<32x128xf32>, vector<16x128xf32> -> vector<16x128xf32>
    %90 = arith.addf %88, %89 : vector<16x128xf32>
    %91 = arith.negf %90 : vector<16x128xf32>
    %92 = math.exp %91 : vector<16x128xf32>
    %cst_38 = arith.constant 1.000000e+00 : f32
    %93 = vector.broadcast %cst_38 : f32 to vector<16x128xf32>
    %94 = arith.addf %93, %92 : vector<16x128xf32>
    %95 = arith.divf %93, %94 : vector<16x128xf32>
    %96 = vector.extract_strided_slice %90 {offsets = [0, 64], sizes = [16, 32], strides = [1, 1]} : vector<16x128xf32> to vector<16x32xf32>
    %97 = math.tanh %96 : vector<16x32xf32>
    %98 = vector.extract_strided_slice %95 {offsets = [0, 0], sizes = [16, 32], strides = [1, 1]} : vector<16x128xf32> to vector<16x32xf32>
    %99 = vector.extract_strided_slice %95 {offsets = [0, 32], sizes = [16, 32], strides = [1, 1]} : vector<16x128xf32> to vector<16x32xf32>
    %100 = vector.extract_strided_slice %95 {offsets = [0, 96], sizes = [16, 32], strides = [1, 1]} : vector<16x128xf32> to vector<16x32xf32>
    %101 = arith.mulf %99, %84 : vector<16x32xf32>
    %102 = arith.mulf %98, %97 : vector<16x32xf32>
    %103 = arith.addf %101, %102 : vector<16x32xf32>
    %104 = math.tanh %103 : vector<16x32xf32>
    %105 = arith.mulf %100, %104 : vector<16x32xf32>
    %c64_39 = arith.constant 64 : index
    %c0_40 = arith.constant 0 : index
    %106 = vector.load %arg13[%c64_39, %c0_40] : memref<128x32xf32, #tpu.memory_space<vmem>>, vector<16x32xf32>
    tpu.vector_store %arg13[%c64_39, %c0_40], %105 {strides = array<i32>} : memref<128x32xf32, #tpu.memory_space<vmem>>, vector<16x32xf32>,
    %c80 = arith.constant 80 : index
    %c0_41 = arith.constant 0 : index
    %107 = vector.load %arg12[%c80, %c0_41] : memref<128x128xf32, #tpu.memory_space<vmem>>, vector<16x128xf32>
    %cst_42 = arith.constant dense<0.000000e+00> : vector<16x128xf32>
    %108 = tpu.matmul %105, %7, %cst_42 {dimension_numbers = #tpu.dot_dimension_numbers<[1], [0], [0], [1], [0, 0, 1, 1], [], []>} : vector<16x32xf32>, vector<32x128xf32>, vector<16x128xf32> -> vector<16x128xf32>
    %109 = arith.addf %107, %108 : vector<16x128xf32>
    %110 = arith.negf %109 : vector<16x128xf32>
    %111 = math.exp %110 : vector<16x128xf32>
    %cst_43 = arith.constant 1.000000e+00 : f32
    %112 = vector.broadcast %cst_43 : f32 to vector<16x128xf32>
    %113 = arith.addf %112, %111 : vector<16x128xf32>
    %114 = arith.divf %112, %113 : vector<16x128xf32>
    %115 = vector.extract_strided_slice %109 {offsets = [0, 64], sizes = [16, 32], strides = [1, 1]} : vector<16x128xf32> to vector<16x32xf32>
    %116 = math.tanh %115 : vector<16x32xf32>
    %117 = vector.extract_strided_slice %114 {offsets = [0, 0], sizes = [16, 32], strides = [1, 1]} : vector<16x128xf32> to vector<16x32xf32>
    %118 = vector.extract_strided_slice %114 {offsets = [0, 32], sizes = [16, 32], strides = [1, 1]} : vector<16x128xf32> to vector<16x32xf32>
    %119 = vector.extract_strided_slice %114 {offsets = [0, 96], sizes = [16, 32], strides = [1, 1]} : vector<16x128xf32> to vector<16x32xf32>
    %120 = arith.mulf %118, %103 : vector<16x32xf32>
    %121 = arith.mulf %117, %116 : vector<16x32xf32>
    %122 = arith.addf %120, %121 : vector<16x32xf32>
    %123 = math.tanh %122 : vector<16x32xf32>
    %124 = arith.mulf %119, %123 : vector<16x32xf32>
    %c80_44 = arith.constant 80 : index
    %c0_45 = arith.constant 0 : index
    %125 = vector.load %arg13[%c80_44, %c0_45] : memref<128x32xf32, #tpu.memory_space<vmem>>, vector<16x32xf32>
    tpu.vector_store %arg13[%c80_44, %c0_45], %124 {strides = array<i32>} : memref<128x32xf32, #tpu.memory_space<vmem>>, vector<16x32xf32>,
    %c96 = arith.constant 96 : index
    %c0_46 = arith.constant 0 : index
    %126 = vector.load %arg12[%c96, %c0_46] : memref<128x128xf32, #tpu.memory_space<vmem>>, vector<16x128xf32>
    %cst_47 = arith.constant dense<0.000000e+00> : vector<16x128xf32>
    %127 = tpu.matmul %124, %7, %cst_47 {dimension_numbers = #tpu.dot_dimension_numbers<[1], [0], [0], [1], [0, 0, 1, 1], [], []>} : vector<16x32xf32>, vector<32x128xf32>, vector<16x128xf32> -> vector<16x128xf32>
    %128 = arith.addf %126, %127 : vector<16x128xf32>
    %129 = arith.negf %128 : vector<16x128xf32>
    %130 = math.exp %129 : vector<16x128xf32>
    %cst_48 = arith.constant 1.000000e+00 : f32
    %131 = vector.broadcast %cst_48 : f32 to vector<16x128xf32>
    %132 = arith.addf %131, %130 : vector<16x128xf32>
    %133 = arith.divf %131, %132 : vector<16x128xf32>
    %134 = vector.extract_strided_slice %128 {offsets = [0, 64], sizes = [16, 32], strides = [1, 1]} : vector<16x128xf32> to vector<16x32xf32>
    %135 = math.tanh %134 : vector<16x32xf32>
    %136 = vector.extract_strided_slice %133 {offsets = [0, 0], sizes = [16, 32], strides = [1, 1]} : vector<16x128xf32> to vector<16x32xf32>
    %137 = vector.extract_strided_slice %133 {offsets = [0, 32], sizes = [16, 32], strides = [1, 1]} : vector<16x128xf32> to vector<16x32xf32>
    %138 = vector.extract_strided_slice %133 {offsets = [0, 96], sizes = [16, 32], strides = [1, 1]} : vector<16x128xf32> to vector<16x32xf32>
    %139 = arith.mulf %137, %122 : vector<16x32xf32>
    %140 = arith.mulf %136, %135 : vector<16x32xf32>
    %141 = arith.addf %139, %140 : vector<16x32xf32>
    %142 = math.tanh %141 : vector<16x32xf32>
    %143 = arith.mulf %138, %142 : vector<16x32xf32>
    %c96_49 = arith.constant 96 : index
    %c0_50 = arith.constant 0 : index
    %144 = vector.load %arg13[%c96_49, %c0_50] : memref<128x32xf32, #tpu.memory_space<vmem>>, vector<16x32xf32>
    tpu.vector_store %arg13[%c96_49, %c0_50], %143 {strides = array<i32>} : memref<128x32xf32, #tpu.memory_space<vmem>>, vector<16x32xf32>,
    %c112 = arith.constant 112 : index
    %c0_51 = arith.constant 0 : index
    %145 = vector.load %arg12[%c112, %c0_51] : memref<128x128xf32, #tpu.memory_space<vmem>>, vector<16x128xf32>
    %cst_52 = arith.constant dense<0.000000e+00> : vector<16x128xf32>
    %146 = tpu.matmul %143, %7, %cst_52 {dimension_numbers = #tpu.dot_dimension_numbers<[1], [0], [0], [1], [0, 0, 1, 1], [], []>} : vector<16x32xf32>, vector<32x128xf32>, vector<16x128xf32> -> vector<16x128xf32>
    %147 = arith.addf %145, %146 : vector<16x128xf32>
    %148 = arith.negf %147 : vector<16x128xf32>
    %149 = math.exp %148 : vector<16x128xf32>
    %cst_53 = arith.constant 1.000000e+00 : f32
    %150 = vector.broadcast %cst_53 : f32 to vector<16x128xf32>
    %151 = arith.addf %150, %149 : vector<16x128xf32>
    %152 = arith.divf %150, %151 : vector<16x128xf32>
    %153 = vector.extract_strided_slice %147 {offsets = [0, 64], sizes = [16, 32], strides = [1, 1]} : vector<16x128xf32> to vector<16x32xf32>
    %154 = math.tanh %153 : vector<16x32xf32>
    %155 = vector.extract_strided_slice %152 {offsets = [0, 0], sizes = [16, 32], strides = [1, 1]} : vector<16x128xf32> to vector<16x32xf32>
    %156 = vector.extract_strided_slice %152 {offsets = [0, 32], sizes = [16, 32], strides = [1, 1]} : vector<16x128xf32> to vector<16x32xf32>
    %157 = vector.extract_strided_slice %152 {offsets = [0, 96], sizes = [16, 32], strides = [1, 1]} : vector<16x128xf32> to vector<16x32xf32>
    %158 = arith.mulf %156, %141 : vector<16x32xf32>
    %159 = arith.mulf %155, %154 : vector<16x32xf32>
    %160 = arith.addf %158, %159 : vector<16x32xf32>
    %161 = math.tanh %160 : vector<16x32xf32>
    %162 = arith.mulf %157, %161 : vector<16x32xf32>
    %c112_54 = arith.constant 112 : index
    %c0_55 = arith.constant 0 : index
    %163 = vector.load %arg13[%c112_54, %c0_55] : memref<128x32xf32, #tpu.memory_space<vmem>>, vector<16x32xf32>
    tpu.vector_store %arg13[%c112_54, %c0_55], %162 {strides = array<i32>} : memref<128x32xf32, #tpu.memory_space<vmem>>, vector<16x32xf32>,
    %c0_56 = arith.constant 0 : index
    %c0_57 = arith.constant 0 : index
    %164 = vector.load %arg13[%c0_56, %c0_57] : memref<128x32xf32, #tpu.memory_space<vmem>>, vector<128x32xf32>
    %c0_58 = arith.constant 0 : index
    %c0_59 = arith.constant 0 : index
    %165 = vector.load %arg4[%c0_58, %c0_59] : memref<32x128xf32, #tpu.memory_space<vmem>>, vector<32x128xf32>
    %cst_60 = arith.constant dense<0.000000e+00> : vector<128x128xf32>
    %166 = tpu.matmul %164, %165, %cst_60 {dimension_numbers = #tpu.dot_dimension_numbers<[1], [0], [0], [1], [0, 0, 1, 1], [], []>} : vector<128x32xf32>, vector<32x128xf32>, vector<128x128xf32> -> vector<128x128xf32>
    %c0_61 = arith.constant 0 : index
    %c0_62 = arith.constant 0 : index
    %167 = vector.load %arg6[%c0_61, %c0_62] : memref<1x128xf32, #tpu.memory_space<vmem>>, vector<1x128xf32>
    %168 = vector.broadcast %167 : vector<1x128xf32> to vector<128x128xf32>
    %169 = arith.addf %166, %168 : vector<128x128xf32>
    %c0_63 = arith.constant 0 : index
    %c0_64 = arith.constant 0 : index
    %170 = vector.load %arg14[%c0_63, %c0_64] : memref<128x128xf32, #tpu.memory_space<vmem>>, vector<128x128xf32>
    tpu.vector_store %arg14[%c0_63, %c0_64], %169 {strides = array<i32>} : memref<128x128xf32, #tpu.memory_space<vmem>>, vector<128x128xf32>,
    %c0_65 = arith.constant 0 : index
    %c0_66 = arith.constant 0 : index
    %171 = vector.load %arg5[%c0_65, %c0_66] : memref<32x128xf32, #tpu.memory_space<vmem>>, vector<32x128xf32>
    %c1 = arith.constant 1 : index
    %c0_67 = arith.constant 0 : index
    %c0_68 = arith.constant 0 : index
    %172 = vector.load %arg7[%c1, %c0_67, %c0_68] : memref<2x16x32xf32, #tpu.memory_space<vmem>>, vector<1x16x32xf32>
    %173 = vector.shape_cast %172 : vector<1x16x32xf32> to vector<16x32xf32>
    %c1_69 = arith.constant 1 : index
    %c0_70 = arith.constant 0 : index
    %c0_71 = arith.constant 0 : index
    %174 = vector.load %arg8[%c1_69, %c0_70, %c0_71] : memref<2x16x32xf32, #tpu.memory_space<vmem>>, vector<1x16x32xf32>
    %175 = vector.shape_cast %174 : vector<1x16x32xf32> to vector<16x32xf32>
    %c0_72 = arith.constant 0 : index
    %c0_73 = arith.constant 0 : index
    %176 = vector.load %arg14[%c0_72, %c0_73] : memref<128x128xf32, #tpu.memory_space<vmem>>, vector<16x128xf32>
    %cst_74 = arith.constant dense<0.000000e+00> : vector<16x128xf32>
    %177 = tpu.matmul %173, %171, %cst_74 {dimension_numbers = #tpu.dot_dimension_numbers<[1], [0], [0], [1], [0, 0, 1, 1], [], []>} : vector<16x32xf32>, vector<32x128xf32>, vector<16x128xf32> -> vector<16x128xf32>
    %178 = arith.addf %176, %177 : vector<16x128xf32>
    %179 = arith.negf %178 : vector<16x128xf32>
    %180 = math.exp %179 : vector<16x128xf32>
    %cst_75 = arith.constant 1.000000e+00 : f32
    %181 = vector.broadcast %cst_75 : f32 to vector<16x128xf32>
    %182 = arith.addf %181, %180 : vector<16x128xf32>
    %183 = arith.divf %181, %182 : vector<16x128xf32>
    %184 = vector.extract_strided_slice %178 {offsets = [0, 64], sizes = [16, 32], strides = [1, 1]} : vector<16x128xf32> to vector<16x32xf32>
    %185 = math.tanh %184 : vector<16x32xf32>
    %186 = vector.extract_strided_slice %183 {offsets = [0, 0], sizes = [16, 32], strides = [1, 1]} : vector<16x128xf32> to vector<16x32xf32>
    %187 = vector.extract_strided_slice %183 {offsets = [0, 32], sizes = [16, 32], strides = [1, 1]} : vector<16x128xf32> to vector<16x32xf32>
    %188 = vector.extract_strided_slice %183 {offsets = [0, 96], sizes = [16, 32], strides = [1, 1]} : vector<16x128xf32> to vector<16x32xf32>
    %189 = arith.mulf %187, %175 : vector<16x32xf32>
    %190 = arith.mulf %186, %185 : vector<16x32xf32>
    %191 = arith.addf %189, %190 : vector<16x32xf32>
    %192 = math.tanh %191 : vector<16x32xf32>
    %193 = arith.mulf %188, %192 : vector<16x32xf32>
    %c16_76 = arith.constant 16 : index
    %c0_77 = arith.constant 0 : index
    %194 = vector.load %arg14[%c16_76, %c0_77] : memref<128x128xf32, #tpu.memory_space<vmem>>, vector<16x128xf32>
    %cst_78 = arith.constant dense<0.000000e+00> : vector<16x128xf32>
    %195 = tpu.matmul %193, %171, %cst_78 {dimension_numbers = #tpu.dot_dimension_numbers<[1], [0], [0], [1], [0, 0, 1, 1], [], []>} : vector<16x32xf32>, vector<32x128xf32>, vector<16x128xf32> -> vector<16x128xf32>
    %196 = arith.addf %194, %195 : vector<16x128xf32>
    %197 = arith.negf %196 : vector<16x128xf32>
    %198 = math.exp %197 : vector<16x128xf32>
    %cst_79 = arith.constant 1.000000e+00 : f32
    %199 = vector.broadcast %cst_79 : f32 to vector<16x128xf32>
    %200 = arith.addf %199, %198 : vector<16x128xf32>
    %201 = arith.divf %199, %200 : vector<16x128xf32>
    %202 = vector.extract_strided_slice %196 {offsets = [0, 64], sizes = [16, 32], strides = [1, 1]} : vector<16x128xf32> to vector<16x32xf32>
    %203 = math.tanh %202 : vector<16x32xf32>
    %204 = vector.extract_strided_slice %201 {offsets = [0, 0], sizes = [16, 32], strides = [1, 1]} : vector<16x128xf32> to vector<16x32xf32>
    %205 = vector.extract_strided_slice %201 {offsets = [0, 32], sizes = [16, 32], strides = [1, 1]} : vector<16x128xf32> to vector<16x32xf32>
    %206 = vector.extract_strided_slice %201 {offsets = [0, 96], sizes = [16, 32], strides = [1, 1]} : vector<16x128xf32> to vector<16x32xf32>
    %207 = arith.mulf %205, %191 : vector<16x32xf32>
    %208 = arith.mulf %204, %203 : vector<16x32xf32>
    %209 = arith.addf %207, %208 : vector<16x32xf32>
    %210 = math.tanh %209 : vector<16x32xf32>
    %211 = arith.mulf %206, %210 : vector<16x32xf32>
    %c32_80 = arith.constant 32 : index
    %c0_81 = arith.constant 0 : index
    %212 = vector.load %arg14[%c32_80, %c0_81] : memref<128x128xf32, #tpu.memory_space<vmem>>, vector<16x128xf32>
    %cst_82 = arith.constant dense<0.000000e+00> : vector<16x128xf32>
    %213 = tpu.matmul %211, %171, %cst_82 {dimension_numbers = #tpu.dot_dimension_numbers<[1], [0], [0], [1], [0, 0, 1, 1], [], []>} : vector<16x32xf32>, vector<32x128xf32>, vector<16x128xf32> -> vector<16x128xf32>
    %214 = arith.addf %212, %213 : vector<16x128xf32>
    %215 = arith.negf %214 : vector<16x128xf32>
    %216 = math.exp %215 : vector<16x128xf32>
    %cst_83 = arith.constant 1.000000e+00 : f32
    %217 = vector.broadcast %cst_83 : f32 to vector<16x128xf32>
    %218 = arith.addf %217, %216 : vector<16x128xf32>
    %219 = arith.divf %217, %218 : vector<16x128xf32>
    %220 = vector.extract_strided_slice %214 {offsets = [0, 64], sizes = [16, 32], strides = [1, 1]} : vector<16x128xf32> to vector<16x32xf32>
    %221 = math.tanh %220 : vector<16x32xf32>
    %222 = vector.extract_strided_slice %219 {offsets = [0, 0], sizes = [16, 32], strides = [1, 1]} : vector<16x128xf32> to vector<16x32xf32>
    %223 = vector.extract_strided_slice %219 {offsets = [0, 32], sizes = [16, 32], strides = [1, 1]} : vector<16x128xf32> to vector<16x32xf32>
    %224 = vector.extract_strided_slice %219 {offsets = [0, 96], sizes = [16, 32], strides = [1, 1]} : vector<16x128xf32> to vector<16x32xf32>
    %225 = arith.mulf %223, %209 : vector<16x32xf32>
    %226 = arith.mulf %222, %221 : vector<16x32xf32>
    %227 = arith.addf %225, %226 : vector<16x32xf32>
    %228 = math.tanh %227 : vector<16x32xf32>
    %229 = arith.mulf %224, %228 : vector<16x32xf32>
    %c48_84 = arith.constant 48 : index
    %c0_85 = arith.constant 0 : index
    %230 = vector.load %arg14[%c48_84, %c0_85] : memref<128x128xf32, #tpu.memory_space<vmem>>, vector<16x128xf32>
    %cst_86 = arith.constant dense<0.000000e+00> : vector<16x128xf32>
    %231 = tpu.matmul %229, %171, %cst_86 {dimension_numbers = #tpu.dot_dimension_numbers<[1], [0], [0], [1], [0, 0, 1, 1], [], []>} : vector<16x32xf32>, vector<32x128xf32>, vector<16x128xf32> -> vector<16x128xf32>
    %232 = arith.addf %230, %231 : vector<16x128xf32>
    %233 = arith.negf %232 : vector<16x128xf32>
    %234 = math.exp %233 : vector<16x128xf32>
    %cst_87 = arith.constant 1.000000e+00 : f32
    %235 = vector.broadcast %cst_87 : f32 to vector<16x128xf32>
    %236 = arith.addf %235, %234 : vector<16x128xf32>
    %237 = arith.divf %235, %236 : vector<16x128xf32>
    %238 = vector.extract_strided_slice %232 {offsets = [0, 64], sizes = [16, 32], strides = [1, 1]} : vector<16x128xf32> to vector<16x32xf32>
    %239 = math.tanh %238 : vector<16x32xf32>
    %240 = vector.extract_strided_slice %237 {offsets = [0, 0], sizes = [16, 32], strides = [1, 1]} : vector<16x128xf32> to vector<16x32xf32>
    %241 = vector.extract_strided_slice %237 {offsets = [0, 32], sizes = [16, 32], strides = [1, 1]} : vector<16x128xf32> to vector<16x32xf32>
    %242 = vector.extract_strided_slice %237 {offsets = [0, 96], sizes = [16, 32], strides = [1, 1]} : vector<16x128xf32> to vector<16x32xf32>
    %243 = arith.mulf %241, %227 : vector<16x32xf32>
    %244 = arith.mulf %240, %239 : vector<16x32xf32>
    %245 = arith.addf %243, %244 : vector<16x32xf32>
    %246 = math.tanh %245 : vector<16x32xf32>
    %247 = arith.mulf %242, %246 : vector<16x32xf32>
    %c64_88 = arith.constant 64 : index
    %c0_89 = arith.constant 0 : index
    %248 = vector.load %arg14[%c64_88, %c0_89] : memref<128x128xf32, #tpu.memory_space<vmem>>, vector<16x128xf32>
    %cst_90 = arith.constant dense<0.000000e+00> : vector<16x128xf32>
    %249 = tpu.matmul %247, %171, %cst_90 {dimension_numbers = #tpu.dot_dimension_numbers<[1], [0], [0], [1], [0, 0, 1, 1], [], []>} : vector<16x32xf32>, vector<32x128xf32>, vector<16x128xf32> -> vector<16x128xf32>
    %250 = arith.addf %248, %249 : vector<16x128xf32>
    %251 = arith.negf %250 : vector<16x128xf32>
    %252 = math.exp %251 : vector<16x128xf32>
    %cst_91 = arith.constant 1.000000e+00 : f32
    %253 = vector.broadcast %cst_91 : f32 to vector<16x128xf32>
    %254 = arith.addf %253, %252 : vector<16x128xf32>
    %255 = arith.divf %253, %254 : vector<16x128xf32>
    %256 = vector.extract_strided_slice %250 {offsets = [0, 64], sizes = [16, 32], strides = [1, 1]} : vector<16x128xf32> to vector<16x32xf32>
    %257 = math.tanh %256 : vector<16x32xf32>
    %258 = vector.extract_strided_slice %255 {offsets = [0, 0], sizes = [16, 32], strides = [1, 1]} : vector<16x128xf32> to vector<16x32xf32>
    %259 = vector.extract_strided_slice %255 {offsets = [0, 32], sizes = [16, 32], strides = [1, 1]} : vector<16x128xf32> to vector<16x32xf32>
    %260 = vector.extract_strided_slice %255 {offsets = [0, 96], sizes = [16, 32], strides = [1, 1]} : vector<16x128xf32> to vector<16x32xf32>
    %261 = arith.mulf %259, %245 : vector<16x32xf32>
    %262 = arith.mulf %258, %257 : vector<16x32xf32>
    %263 = arith.addf %261, %262 : vector<16x32xf32>
    %264 = math.tanh %263 : vector<16x32xf32>
    %265 = arith.mulf %260, %264 : vector<16x32xf32>
    %c80_92 = arith.constant 80 : index
    %c0_93 = arith.constant 0 : index
    %266 = vector.load %arg14[%c80_92, %c0_93] : memref<128x128xf32, #tpu.memory_space<vmem>>, vector<16x128xf32>
    %cst_94 = arith.constant dense<0.000000e+00> : vector<16x128xf32>
    %267 = tpu.matmul %265, %171, %cst_94 {dimension_numbers = #tpu.dot_dimension_numbers<[1], [0], [0], [1], [0, 0, 1, 1], [], []>} : vector<16x32xf32>, vector<32x128xf32>, vector<16x128xf32> -> vector<16x128xf32>
    %268 = arith.addf %266, %267 : vector<16x128xf32>
    %269 = arith.negf %268 : vector<16x128xf32>
    %270 = math.exp %269 : vector<16x128xf32>
    %cst_95 = arith.constant 1.000000e+00 : f32
    %271 = vector.broadcast %cst_95 : f32 to vector<16x128xf32>
    %272 = arith.addf %271, %270 : vector<16x128xf32>
    %273 = arith.divf %271, %272 : vector<16x128xf32>
    %274 = vector.extract_strided_slice %268 {offsets = [0, 64], sizes = [16, 32], strides = [1, 1]} : vector<16x128xf32> to vector<16x32xf32>
    %275 = math.tanh %274 : vector<16x32xf32>
    %276 = vector.extract_strided_slice %273 {offsets = [0, 0], sizes = [16, 32], strides = [1, 1]} : vector<16x128xf32> to vector<16x32xf32>
    %277 = vector.extract_strided_slice %273 {offsets = [0, 32], sizes = [16, 32], strides = [1, 1]} : vector<16x128xf32> to vector<16x32xf32>
    %278 = vector.extract_strided_slice %273 {offsets = [0, 96], sizes = [16, 32], strides = [1, 1]} : vector<16x128xf32> to vector<16x32xf32>
    %279 = arith.mulf %277, %263 : vector<16x32xf32>
    %280 = arith.mulf %276, %275 : vector<16x32xf32>
    %281 = arith.addf %279, %280 : vector<16x32xf32>
    %282 = math.tanh %281 : vector<16x32xf32>
    %283 = arith.mulf %278, %282 : vector<16x32xf32>
    %c96_96 = arith.constant 96 : index
    %c0_97 = arith.constant 0 : index
    %284 = vector.load %arg14[%c96_96, %c0_97] : memref<128x128xf32, #tpu.memory_space<vmem>>, vector<16x128xf32>
    %cst_98 = arith.constant dense<0.000000e+00> : vector<16x128xf32>
    %285 = tpu.matmul %283, %171, %cst_98 {dimension_numbers = #tpu.dot_dimension_numbers<[1], [0], [0], [1], [0, 0, 1, 1], [], []>} : vector<16x32xf32>, vector<32x128xf32>, vector<16x128xf32> -> vector<16x128xf32>
    %286 = arith.addf %284, %285 : vector<16x128xf32>
    %287 = arith.negf %286 : vector<16x128xf32>
    %288 = math.exp %287 : vector<16x128xf32>
    %cst_99 = arith.constant 1.000000e+00 : f32
    %289 = vector.broadcast %cst_99 : f32 to vector<16x128xf32>
    %290 = arith.addf %289, %288 : vector<16x128xf32>
    %291 = arith.divf %289, %290 : vector<16x128xf32>
    %292 = vector.extract_strided_slice %286 {offsets = [0, 64], sizes = [16, 32], strides = [1, 1]} : vector<16x128xf32> to vector<16x32xf32>
    %293 = math.tanh %292 : vector<16x32xf32>
    %294 = vector.extract_strided_slice %291 {offsets = [0, 0], sizes = [16, 32], strides = [1, 1]} : vector<16x128xf32> to vector<16x32xf32>
    %295 = vector.extract_strided_slice %291 {offsets = [0, 32], sizes = [16, 32], strides = [1, 1]} : vector<16x128xf32> to vector<16x32xf32>
    %296 = vector.extract_strided_slice %291 {offsets = [0, 96], sizes = [16, 32], strides = [1, 1]} : vector<16x128xf32> to vector<16x32xf32>
    %297 = arith.mulf %295, %281 : vector<16x32xf32>
    %298 = arith.mulf %294, %293 : vector<16x32xf32>
    %299 = arith.addf %297, %298 : vector<16x32xf32>
    %300 = math.tanh %299 : vector<16x32xf32>
    %301 = arith.mulf %296, %300 : vector<16x32xf32>
    %c112_100 = arith.constant 112 : index
    %c0_101 = arith.constant 0 : index
    %302 = vector.load %arg14[%c112_100, %c0_101] : memref<128x128xf32, #tpu.memory_space<vmem>>, vector<16x128xf32>
    %cst_102 = arith.constant dense<0.000000e+00> : vector<16x128xf32>
    %303 = tpu.matmul %301, %171, %cst_102 {dimension_numbers = #tpu.dot_dimension_numbers<[1], [0], [0], [1], [0, 0, 1, 1], [], []>} : vector<16x32xf32>, vector<32x128xf32>, vector<16x128xf32> -> vector<16x128xf32>
    %304 = arith.addf %302, %303 : vector<16x128xf32>
    %305 = arith.negf %304 : vector<16x128xf32>
    %306 = math.exp %305 : vector<16x128xf32>
    %cst_103 = arith.constant 1.000000e+00 : f32
    %307 = vector.broadcast %cst_103 : f32 to vector<16x128xf32>
    %308 = arith.addf %307, %306 : vector<16x128xf32>
    %309 = arith.divf %307, %308 : vector<16x128xf32>
    %310 = vector.extract_strided_slice %304 {offsets = [0, 64], sizes = [16, 32], strides = [1, 1]} : vector<16x128xf32> to vector<16x32xf32>
    %311 = math.tanh %310 : vector<16x32xf32>
    %312 = vector.extract_strided_slice %309 {offsets = [0, 0], sizes = [16, 32], strides = [1, 1]} : vector<16x128xf32> to vector<16x32xf32>
    %313 = vector.extract_strided_slice %309 {offsets = [0, 32], sizes = [16, 32], strides = [1, 1]} : vector<16x128xf32> to vector<16x32xf32>
    %314 = vector.extract_strided_slice %309 {offsets = [0, 96], sizes = [16, 32], strides = [1, 1]} : vector<16x128xf32> to vector<16x32xf32>
    %315 = arith.mulf %313, %299 : vector<16x32xf32>
    %316 = arith.mulf %312, %311 : vector<16x32xf32>
    %317 = arith.addf %315, %316 : vector<16x32xf32>
    %318 = math.tanh %317 : vector<16x32xf32>
    %319 = arith.mulf %314, %318 : vector<16x32xf32>
    %320 = vector.extract_strided_slice %319 {offsets = [0, 0], sizes = [8, 32], strides = [1, 1]} : vector<16x32xf32> to vector<8x32xf32>
    %c0_104 = arith.constant 0 : index
    %c0_105 = arith.constant 0 : index
    %321 = vector.load %arg9[%c0_104, %c0_105] : memref<32x3xf32, #tpu.memory_space<vmem>>, vector<32x3xf32>
    %cst_106 = arith.constant dense<0.000000e+00> : vector<8x3xf32>
    %322 = tpu.matmul %320, %321, %cst_106 {dimension_numbers = #tpu.dot_dimension_numbers<[1], [0], [0], [1], [0, 0, 1, 1], [], []>} : vector<8x32xf32>, vector<32x3xf32>, vector<8x3xf32> -> vector<8x3xf32>
    %c0_107 = arith.constant 0 : index
    %c0_108 = arith.constant 0 : index
    %323 = vector.load %arg10[%c0_107, %c0_108] : memref<1x3xf32, #tpu.memory_space<vmem>>, vector<1x3xf32>
    %324 = vector.broadcast %323 : vector<1x3xf32> to vector<8x3xf32>
    %325 = arith.addf %322, %324 : vector<8x3xf32>
    %c0_109 = arith.constant 0 : index
    %c0_110 = arith.constant 0 : index
    %326 = vector.load %arg11[%c0_109, %c0_110] : memref<8x3xf32, #tpu.memory_space<vmem>>, vector<8x3xf32>
    tpu.vector_store %arg11[%c0_109, %c0_110], %325 {strides = array<i32>} : memref<8x3xf32, #tpu.memory_space<vmem>>, vector<8x3xf32>,
    return
  }
}

</mosaic_0001>

<bundles_post_ra>
// kernel: tpu_custom_call.1
= control target key start
LH: loop header
LB: loop body
LE: loop exit
PB: predicated region body
PF: predicated region fallthrough
CT: control target
= control target key end

     0   :  { %vm63_vm0 = vcmask 130048   ;;  %vm283_vm1 = vcmask 261120   ;;  %s3783_s29 = smov 64   ;;  %vm3785_vm2 = vmmov 0   ;;  %vm2825_vm3 = vcmask 23552   ;;  %s4309_s1 = inlined_call_operand.vmem [shape: f32[16,128], index: 1, kind: input, shape index: {}]   ;;  %s4310_s0 = inlined_call_operand.vmem [shape: f32[128,16], index: 0, kind: input, shape index: {}]   ;;  %s4311_s2 = inlined_call_operand.vmem [shape: f32[32,128], index: 2, kind: input, shape index: {}]   ;;  %s4312_s8 = inlined_call_operand.vmem [shape: f32[2,16,32], index: 8, kind: input, shape index: {}]   ;;  %s4313_s7 = inlined_call_operand.vmem [shape: f32[2,16,32], index: 7, kind: input, shape index: {}]   ;;  %s4314_s3 = inlined_call_operand.vmem [shape: f32[1,128], index: 3, kind: input, shape index: {}]   ;;  %s4315_s4 = inlined_call_operand.vmem [shape: f32[32,128], index: 4, kind: input, shape index: {}]   ;;  %s4316_s5 = inlined_call_operand.vmem [shape: f32[32,128], index: 5, kind: input, shape index: {}]   ;;  %s4317_s6 = inlined_call_operand.vmem [shape: f32[1,128], index: 6, kind: input, shape index: {}]   ;;  %s4318_s9 = inlined_call_operand.vmem [shape: f32[32,3], index: 9, kind: input, shape index: {}]   ;;  %s4319_s10 = inlined_call_operand.vmem [shape: f32[1,3], index: 10, kind: input, shape index: {}]   ;;  %s4320_s11 = inlined_call_operand.vmem [shape: f32[8,3], index: 11, kind: output, shape index: {}]  }
   0x1   :  { %v54_v0 = vld [vmem:[%s4309_s1] sm:$0xff]  ;;  %v55_v1 = vld [vmem:[%s4309_s1 + $0x8] sm:$0xff]  ;;  %v275_v8 = vld [vmem:[%s4311_s2 + $0x10] sm:$0xff] }
   0x2   :  { %v38_v2 = vld [vmem:[%s4310_s0] sm:$0xff]  ;;  %v3320_v3 = vpack.c.bf16 %v55_v1, %v54_v0  ;;  %v274_v5 = vld [vmem:[%s4311_s2 + $0x8] sm:$0xff]  ;;  %v40_v9 = vld [vmem:[%s4310_s0 + $0x10] sm:$0xff] }
   0x3   :  { %3077 = vmatprep.mubr.msk.f32.mxu0 %vm63_vm0, %v38_v2  ;;  %v273_v4 = vld [vmem:[%s4311_s2] sm:$0xff]  ;;  %v39_v7 = vld [vmem:[%s4310_s0 + $0x8] sm:$0xff]  ;;  %v276_v10 = vld [vmem:[%s4311_s2 + $0x18] sm:$0xff]  ;;  %s3782_s2 = smov 32  }
   0x4   :  { %v3863_v6 = vpack.c.bf16 %v274_v5, %v273_v4  ;;  %3321 = vmatprep.subr.bf16.mxu0 %v3320_v3  ;;  %v3878_v11 = vpack.c.bf16 %v276_v10, %v275_v8  ;;  %v41_v12 = vld [vmem:[%s4310_s0 + $0x18] sm:$0xff]  ;;  %v279_v13 = vld [vmem:[%s4312_s8] sm:$0xff]  ;;  %v280_v15 = vld [vmem:[%s4312_s8 + $0x8] sm:$0xff] }
   0x5   :  { %3323 = vmatpush3.bf16.msra.mxu0 %v3320_v3  ;;  %v42_v14 = vld [vmem:[%s4310_s0 + $0x20] sm:$0xff]  ;;  %383 = vrot.lane.b32.xlu1 %v279_v13, %s3782_s2  ;;  %v43_v16 = vld [vmem:[%s4310_s0 + $0x28] sm:$0xff]  ;;  %v44_v17 = vld [vmem:[%s4310_s0 + $0x30] sm:$0xff] }
   0x6   :  { %3325 = vmatprep.subr.bf16.mxu0 %v3863_v6  ;;  %v45_v18 = vld [vmem:[%s4310_s0 + $0x38] sm:$0xff]  ;;  %v46_v19 = vld [vmem:[%s4310_s0 + $0x40] sm:$0xff]  ;;  %v47_v20 = vld [vmem:[%s4310_s0 + $0x48] sm:$0xff] }
   0x7   :  { %v48_v21 = vld [vmem:[%s4310_s0 + $0x50] sm:$0xff]  ;;  %v49_v22 = vld [vmem:[%s4310_s0 + $0x58] sm:$0xff]  ;;  %v50_v23 = vld [vmem:[%s4310_s0 + $0x60] sm:$0xff] }
   0x8   :  { %3078 = vmatmul.mubr.msk.f32.vlgmr.msra.gmra.mrb[0].mxu0 %vm63_vm0, %v39_v7  ;;  %v51_v24 = vld [vmem:[%s4310_s0 + $0x68] sm:$0xff]  ;;  %v52_v25 = vld [vmem:[%s4310_s0 + $0x70] sm:$0xff]  ;;  %v53_v26 = vld [vmem:[%s4310_s0 + $0x78] sm:$0xff] }
   0x9   :  { %3327 = vmatpush3.bf16.msra.mxu0 %v3863_v6  ;;  %3080 = vmatprep.mubr.msk.f32.mxu0 %vm63_vm0, %v40_v9  ;;  %v277_v27 = vld [vmem:[%s4313_s7] sm:$0xff]  ;;  %v278_v28 = vld [vmem:[%s4313_s7 + $0x8] sm:$0xff]  ;;  %v1438_v61 = vld [vmem:[%s4315_s4 + $0x10] sm:$0xff] }
   0xa   :  { %3329 = vmatprep.subr.bf16.mxu0 %v3878_v11  ;;  %385 = vrot.lane.b32.xlu1 %v280_v15, %s3782_s2  ;;  %v3961_v29 = vld [vmem:[%s4314_s3] ss:$0 sm:$0xff]  ;;  %v1437_v59 = vld [vmem:[%s4315_s4 + $0x8] sm:$0xff]  ;;  %v1439_v62 = vld [vmem:[%s4315_s4 + $0x18] sm:$0xff] }
   0xb   :  { %v1436_v58 = vld [vmem:[%s4315_s4] sm:$0xff]  ;;  %v3392_v63 = vpack.c.bf16 %v1439_v62, %v1438_v61 }
   0xc   :  { %3081 = vmatmul.mubr.msk.f32.gmra.mrb[2].mxu0 %vm63_vm0, %v41_v12  ;;  %v3388_v60 = vpack.c.bf16 %v1437_v59, %v1436_v58 }
   0xd   :  { %3083 = vmatprep.mubr.msk.f32.mxu0 %vm63_vm0, %v42_v14  ;;  %3331 = vmatpush3.bf16.msra.mxu0 %v3878_v11 }
   0xe   :  { %3333 = vmatprep.subr.bf16.mxu0 %v3863_v6  ;;  %3389 = vmatprep.subr.bf16.mxu1 %v3388_v60 }
   0xf   :  { %3391 = vmatpush3.bf16.msra.mxu1 %v3388_v60 }
  0x10   :  { %3084 = vmatmul.mubr.msk.f32.gmra.mrb[4].mxu0 %vm63_vm0, %v43_v16  ;;  %3393 = vmatprep.subr.bf16.mxu1 %v3392_v63 }
  0x11   :  { %3086 = vmatprep.mubr.msk.f32.mxu0 %vm63_vm0, %v44_v17 }
  0x13   :  { %3395 = vmatpush3.bf16.msra.mxu1 %v3392_v63 }
  0x14   :  { %3087 = vmatmul.mubr.msk.f32.gmra.mrb[6].mxu0 %vm63_vm0, %v45_v18 }
  0x15   :  { %3089 = vmatprep.mubr.msk.f32.mxu0 %vm63_vm0, %v46_v19 }
  0x18   :  { %3090 = vmatmul.mubr.msk.f32.gmra.mrb[8].mxu0 %vm63_vm0, %v47_v20 }
  0x19   :  { %3092 = vmatprep.mubr.msk.f32.mxu0 %vm63_vm0, %v48_v21 }
  0x1c   :  { %3093 = vmatmul.mubr.msk.f32.gmra.mrb[10].mxu0 %vm63_vm0, %v49_v22 }
  0x1d   :  { %3095 = vmatprep.mubr.msk.f32.mxu0 %vm63_vm0, %v50_v23 }
  0x20   :  { %3096 = vmatmul.mubr.msk.f32.gmra.mrb[12].mxu0 %vm63_vm0, %v51_v24 }
  0x21   :  { %3098 = vmatprep.mubr.msk.f32.mxu0 %vm63_vm0, %v52_v25 }
  0x24   :  { %3099 = vmatmul.mubr.msk.f32.gmra.mrb[14].mxu0 %vm63_vm0, %v53_v26 }
  0x25   :  { %3109 = vmatprep.mubr.msk.f32.mxu0 %vm283_vm1, %v277_v27 }
  0x28   :  { %3110 = vmatmul.mubr.msk.f32.vlgmr.msra.gmra.mrb[0].mxu0 %vm283_vm1, %v278_v28 }
  0x29   :  { %3335 = vmatpush3.bf16.msra.mxu0 %v3863_v6 }
  0x2a   :  { %3337 = vmatprep.subr.bf16.mxu0 %v3878_v11 }
  0x2d   :  { %3339 = vmatpush3.bf16.msra.mxu0 %v3878_v11 }
  0x2e   :  { %3341 = vmatprep.subr.bf16.mxu0 %v3863_v6 }
  0x77   :  { %v384_v48 = vpop.permute.xlu1 %383 }
  0x7c   :  { %v386_v50 = vpop.permute.xlu1 %385 }
  0xfb   :  { %v3111_v30 = vpop.f32.mrb[0].mxu0 }
  0xfc   :  { %v356_v31 = vpop.f32.mrb[1].mxu0  ;;  %v3466_v33 = vadd.f32 %v3111_v30, %v3961_v29 }
  0xfd   :  { %v3467_v32 = vadd.f32 %v3961_v29, %v356_v31 }
  0xfe   :  { %v2851_v37 = vmul.f32 -1.442695, %v3466_v33 }
  0xff   :  { %3534 = vtanh.f32 %v3467_v32  ;;  %v2850_v36 = vmul.f32 -1.442695, %v3467_v32 }
 0x100   :  { %3536 = vtanh.f32 %v3466_v33 }
 0x101   :  { %3538 = vpow2.f32 %v2850_v36 }
 0x102   :  { %3540 = vpow2.f32 %v2851_v37 }
 0x109   :  { %v3535_v34 = vpop.eup %3534 }
 0x10a   :  { %393 = vrot.lane.b32.xlu0 %v3535_v34, %s3783_s29  ;;  %v3537_v35 = vpop.eup %3536 }
 0x10b   :  { %v3539_v38 = vpop.eup %3538 }
 0x10c   :  { %v373_v39 = vadd.f32 1.0, %v3539_v38  ;;  %v3541_v40 = vpop.eup %3540 }
 0x10d   :  { %v374_v41 = vadd.f32 1.0, %v3541_v40 }
 0x10e   :  { %395 = vrot.lane.b32.xlu0 %v3537_v35, %s3783_s29  ;;  %3542 = vrcp.f32 %v373_v39 }
 0x10f   :  { %3544 = vrcp.f32 %v374_v41 }
 0x118   :  { %v3543_v42 = vpop.eup %3542 }
 0x119   :  { %v3545_v45 = vpop.eup %3544  ;;  %v389_v49 = vmul.f32 %v3543_v42, %v384_v48 }
 0x11a   :  { %v390_v53 = vmul.f32 %v3545_v45, %v386_v50 }
 0x17c   :  { %v394_v43 = vpop.permute.xlu0 %393 }
 0x17d   :  { %v399_v44 = vmul.f32 %v3543_v42, %v394_v43 }
 0x17f   :  { %403 = vrot.lane.b32.xlu0 %v399_v44, %s3782_s2 }
 0x180   :  { %v396_v46 = vpop.permute.xlu0 %395 }
 0x181   :  { %v400_v47 = vmul.f32 %v3545_v45, %v396_v46 }
 0x183   :  { %405 = vrot.lane.b32.xlu1 %v400_v47, %s3782_s2 }
 0x1f1   :  { %v404_v51 = vpop.permute.xlu0 %403 }
 0x1f2   :  { %v3969_v52 = vadd.f32 %v404_v51, %v389_v49 }
 0x1f4   :  { %3546 = vtanh.f32 %v3969_v52 }
 0x1f5   :  { %v406_v54 = vpop.permute.xlu1 %405 }
 0x1f6   :  { %v3972_v55 = vadd.f32 %v406_v54, %v390_v53 }
 0x1f8   :  { %3548 = vtanh.f32 %v3972_v55 }
 0x1fe   :  { %v3547_v56 = vpop.eup %3546 }
 0x1ff   :  { %415 = vrot.lane.b32.xlu0 %v3547_v56, %s3783_s29 }
 0x202   :  { %v3549_v57 = vpop.eup %3548 }
 0x203   :  { %417 = vrot.lane.b32.xlu1 %v3549_v57, %s3783_s29 }
 0x271   :  { %v416_v0 = vpop.permute.xlu0 %415 }
 0x272   :  { %v421_v1 = vmul.f32 %v3543_v42, %v416_v0 }
 0x274   :  { %425 = vrot.lane.b32.xlu0 %v421_v1, %s3782_s2 }
 0x275   :  { %v418_v2 = vpop.permute.xlu1 %417 }
 0x276   :  { %v422_v3 = vmul.f32 %v3545_v45, %v418_v2 }
 0x278   :  { %427 = vrot.lane.b32.xlu1 %v422_v3, %s3782_s2 }
 0x2e6   :  { %v426_v4 = vpop.permute.xlu0 %425 }
 0x2e7   :  { %431 = vst.msk [vmem:[#allocation3] sm:$0xff] %vm283_vm1, %v426_v4  ;;  %3120 = vmatprep.mubr.msk.f32.mxu0 %vm283_vm1, %v426_v4 }
 0x2ea   :  { %v428_v5 = vpop.permute.xlu1 %427 }
 0x2eb   :  { %432 = vst.msk [vmem:[#allocation3 + $0x8] sm:$0xff] %vm283_vm1, %v428_v5  ;;  %3121 = vmatmul.mubr.msk.f32.vlgmr.msra.gmra.mrb[2].mxu0 %vm283_vm1, %v428_v5 }
 0x2ec   :  { %3343 = vmatpush3.bf16.msra.mxu0 %v3863_v6 }
 0x2ed   :  { %3345 = vmatprep.subr.bf16.mxu0 %v3878_v11 }
 0x2ee   :  { %v1420_v7 = vld [vmem:[#allocation3] sm:$0xff] }
 0x2ef   :  { %3197 = vmatprep.mubr.msk.f32.mxu1 %vm283_vm1, %v1420_v7 }
 0x2f0   :  { %3347 = vmatpush3.bf16.msra.mxu0 %v3878_v11 }
 0x2f1   :  { %3349 = vmatprep.subr.bf16.mxu0 %v3863_v6 }
 0x2f2   :  { %v1421_v8 = vld [vmem:[#allocation3 + $0x8] sm:$0xff] }
 0x2f3   :  { %3198 = vmatmul.mubr.msk.f32.vlgmr.msra.gmra.mrb[0].mxu1 %vm283_vm1, %v1421_v8 }
 0x3be   :  { %v3122_v9 = vpop.f32.mrb[2].mxu0 }
 0x3bf   :  { %v3468_v10 = vadd.f32 %v3122_v9, %v3961_v29  ;;  %v505_v12 = vpop.f32.mrb[3].mxu0 }
 0x3c0   :  { %v3469_v13 = vadd.f32 %v3961_v29, %v505_v12 }
 0x3c1   :  { %3550 = vtanh.f32 %v3468_v10  ;;  %v2855_v16 = vmul.f32 -1.442695, %v3468_v10 }
 0x3c2   :  { %3552 = vtanh.f32 %v3469_v13  ;;  %v2854_v17 = vmul.f32 -1.442695, %v3469_v13 }
 0x3c3   :  { %3554 = vpow2.f32 %v2855_v16 }
 0x3c4   :  { %3556 = vpow2.f32 %v2854_v17 }
 0x3cb   :  { %v3551_v14 = vpop.eup %3550 }
 0x3cc   :  { %v3553_v15 = vpop.eup %3552  ;;  %536 = vrot.lane.b32.xlu1 %v3551_v14, %s3783_s29 }
 0x3cd   :  { %534 = vrot.lane.b32.xlu0 %v3553_v15, %s3783_s29  ;;  %v3555_v18 = vpop.eup %3554 }
 0x3ce   :  { %v3557_v19 = vpop.eup %3556  ;;  %v523_v20 = vadd.f32 1.0, %v3555_v18 }
 0x3cf   :  { %v522_v21 = vadd.f32 1.0, %v3557_v19 }
 0x3d0   :  { %3558 = vrcp.f32 %v523_v20 }
 0x3d1   :  { %3560 = vrcp.f32 %v522_v21 }
 0x3da   :  { %v3559_v22 = vpop.eup %3558 }
 0x3db   :  { %v3561_v24 = vpop.eup %3560  ;;  %v531_v28 = vmul.f32 %v3559_v22, %v3972_v55 }
 0x3dc   :  { %v530_v31 = vmul.f32 %v3561_v24, %v3969_v52 }
 0x43e   :  { %v537_v23 = vpop.permute.xlu1 %536 }
 0x43f   :  { %v541_v25 = vmul.f32 %v3559_v22, %v537_v23  ;;  %v535_v26 = vpop.permute.xlu0 %534 }
 0x440   :  { %v540_v27 = vmul.f32 %v3561_v24, %v535_v26 }
 0x441   :  { %546 = vrot.lane.b32.xlu1 %v541_v25, %s3782_s2 }
 0x442   :  { %544 = vrot.lane.b32.xlu0 %v540_v27, %s3782_s2 }
 0x4b3   :  { %v547_v30 = vpop.permute.xlu1 %546 }
 0x4b4   :  { %v551_v32 = vadd.f32 %v547_v30, %v531_v28  ;;  %v545_v33 = vpop.permute.xlu0 %544 }
 0x4b5   :  { %v550_v34 = vadd.f32 %v545_v33, %v530_v31 }
 0x4b6   :  { %3562 = vtanh.f32 %v551_v32 }
 0x4b7   :  { %3564 = vtanh.f32 %v550_v34 }
 0x4c0   :  { %v3563_v35 = vpop.eup %3562 }
 0x4c1   :  { %v3565_v36 = vpop.eup %3564  ;;  %558 = vrot.lane.b32.xlu1 %v3563_v35, %s3783_s29 }
 0x4c2   :  { %556 = vrot.lane.b32.xlu0 %v3565_v36, %s3783_s29 }
 0x533   :  { %v559_v37 = vpop.permute.xlu1 %558 }
 0x534   :  { %v563_v38 = vmul.f32 %v3559_v22, %v559_v37  ;;  %v557_v39 = vpop.permute.xlu0 %556 }
 0x535   :  { %v562_v40 = vmul.f32 %v3561_v24, %v557_v39 }
 0x536   :  { %568 = vrot.lane.b32.xlu1 %v563_v38, %s3782_s2 }
 0x537   :  { %566 = vrot.lane.b32.xlu0 %v562_v40, %s3782_s2 }
 0x5a8   :  { %v569_v41 = vpop.permute.xlu1 %568 }
 0x5a9   :  { %573 = vst.msk [vmem:[#allocation3 + $0x18] sm:$0xff] %vm283_vm1, %v569_v41  ;;  %v567_v42 = vpop.permute.xlu0 %566 }
 0x5aa   :  { %572 = vst.msk [vmem:[#allocation3 + $0x10] sm:$0xff] %vm283_vm1, %v567_v42  ;;  %3131 = vmatprep.mubr.msk.f32.mxu0 %vm283_vm1, %v567_v42 }
 0x5ab   :  { %3132 = vmatmul.mubr.msk.f32.vlgmr.msra.gmra.mrb[4].mxu0 %vm283_vm1, %v569_v41 }
 0x5ac   :  { %3351 = vmatpush3.bf16.msra.mxu0 %v3863_v6 }
 0x5ad   :  { %3353 = vmatprep.subr.bf16.mxu0 %v3878_v11 }
 0x5b0   :  { %3355 = vmatpush3.bf16.msra.mxu0 %v3878_v11  ;;  %v1423_v44 = vld [vmem:[#allocation3 + $0x18] sm:$0xff] }
 0x5b1   :  { %v1422_v43 = vld [vmem:[#allocation3 + $0x10] sm:$0xff]  ;;  %3357 = vmatprep.subr.bf16.mxu0 %v3863_v6 }
 0x5b2   :  { %3200 = vmatprep.mubr.msk.f32.mxu1 %vm283_vm1, %v1422_v43 }
 0x5b3   :  { %3201 = vmatmul.mubr.msk.f32.gmra.mrb[2].mxu1 %vm283_vm1, %v1423_v44 }
 0x67e   :  { %v3133_v45 = vpop.f32.mrb[4].mxu0 }
 0x67f   :  { %v3470_v46 = vadd.f32 %v3133_v45, %v3961_v29  ;;  %v646_v47 = vpop.f32.mrb[5].mxu0 }
 0x680   :  { %v3471_v48 = vadd.f32 %v3961_v29, %v646_v47 }
 0x681   :  { %3566 = vtanh.f32 %v3470_v46  ;;  %v2859_v51 = vmul.f32 -1.442695, %v3470_v46 }
 0x682   :  { %3568 = vtanh.f32 %v3471_v48  ;;  %v2858_v52 = vmul.f32 -1.442695, %v3471_v48 }
 0x683   :  { %3570 = vpow2.f32 %v2859_v51 }
 0x684   :  { %3572 = vpow2.f32 %v2858_v52 }
 0x68b   :  { %v3567_v49 = vpop.eup %3566 }
 0x68c   :  { %v3569_v50 = vpop.eup %3568  ;;  %677 = vrot.lane.b32.xlu1 %v3567_v49, %s3783_s29 }
 0x68d   :  { %675 = vrot.lane.b32.xlu0 %v3569_v50, %s3783_s29  ;;  %v3571_v53 = vpop.eup %3570 }
 0x68e   :  { %v3573_v54 = vpop.eup %3572  ;;  %v664_v55 = vadd.f32 1.0, %v3571_v53 }
 0x68f   :  { %v663_v56 = vadd.f32 1.0, %v3573_v54 }
 0x690   :  { %3574 = vrcp.f32 %v664_v55 }
 0x691   :  { %3576 = vrcp.f32 %v663_v56 }
 0x69a   :  { %v3575_v57 = vpop.eup %3574 }
 0x69b   :  { %v3577_v59 = vpop.eup %3576  ;;  %v672_v63 = vmul.f32 %v3575_v57, %v551_v32 }
 0x69c   :  { %v671_v1 = vmul.f32 %v3577_v59, %v550_v34 }
 0x6fe   :  { %v678_v58 = vpop.permute.xlu1 %677 }
 0x6ff   :  { %v682_v60 = vmul.f32 %v3575_v57, %v678_v58  ;;  %v676_v61 = vpop.permute.xlu0 %675 }
 0x700   :  { %v681_v62 = vmul.f32 %v3577_v59, %v676_v61 }
 0x701   :  { %687 = vrot.lane.b32.xlu1 %v682_v60, %s3782_s2 }
 0x702   :  { %685 = vrot.lane.b32.xlu0 %v681_v62, %s3782_s2 }
 0x773   :  { %v688_v0 = vpop.permute.xlu1 %687 }
 0x774   :  { %v692_v2 = vadd.f32 %v688_v0, %v672_v63  ;;  %v686_v3 = vpop.permute.xlu0 %685 }
 0x775   :  { %v691_v4 = vadd.f32 %v686_v3, %v671_v1 }
 0x776   :  { %3578 = vtanh.f32 %v692_v2 }
 0x777   :  { %3580 = vtanh.f32 %v691_v4 }
 0x780   :  { %v3579_v5 = vpop.eup %3578 }
 0x781   :  { %v3581_v7 = vpop.eup %3580  ;;  %699 = vrot.lane.b32.xlu1 %v3579_v5, %s3783_s29 }
 0x782   :  { %697 = vrot.lane.b32.xlu0 %v3581_v7, %s3783_s29 }
 0x7f3   :  { %v700_v8 = vpop.permute.xlu1 %699 }
 0x7f4   :  { %v704_v9 = vmul.f32 %v3575_v57, %v700_v8  ;;  %v698_v10 = vpop.permute.xlu0 %697 }
 0x7f5   :  { %v703_v12 = vmul.f32 %v3577_v59, %v698_v10 }
 0x7f6   :  { %709 = vrot.lane.b32.xlu1 %v704_v9, %s3782_s2 }
 0x7f7   :  { %707 = vrot.lane.b32.xlu0 %v703_v12, %s3782_s2 }
 0x868   :  { %v710_v13 = vpop.permute.xlu1 %709 }
 0x869   :  { %714 = vst.msk [vmem:[#allocation3 + $0x28] sm:$0xff] %vm283_vm1, %v710_v13  ;;  %v708_v14 = vpop.permute.xlu0 %707 }
 0x86a   :  { %713 = vst.msk [vmem:[#allocation3 + $0x20] sm:$0xff] %vm283_vm1, %v708_v14  ;;  %3142 = vmatprep.mubr.msk.f32.mxu0 %vm283_vm1, %v708_v14 }
 0x86b   :  { %3143 = vmatmul.mubr.msk.f32.vlgmr.msra.gmra.mrb[6].mxu0 %vm283_vm1, %v710_v13 }
 0x86c   :  { %3359 = vmatpush3.bf16.msra.mxu0 %v3863_v6 }
 0x86d   :  { %3361 = vmatprep.subr.bf16.mxu0 %v3878_v11 }
 0x870   :  { %3363 = vmatpush3.bf16.msra.mxu0 %v3878_v11  ;;  %v1425_v16 = vld [vmem:[#allocation3 + $0x28] sm:$0xff] }
 0x871   :  { %v1424_v15 = vld [vmem:[#allocation3 + $0x20] sm:$0xff]  ;;  %3365 = vmatprep.subr.bf16.mxu0 %v3863_v6 }
 0x872   :  { %3203 = vmatprep.mubr.msk.f32.mxu1 %vm283_vm1, %v1424_v15 }
 0x873   :  { %3204 = vmatmul.mubr.msk.f32.gmra.mrb[4].mxu1 %vm283_vm1, %v1425_v16 }
 0x93e   :  { %v3144_v17 = vpop.f32.mrb[6].mxu0 }
 0x93f   :  { %v3472_v18 = vadd.f32 %v3144_v17, %v3961_v29  ;;  %v787_v19 = vpop.f32.mrb[7].mxu0 }
 0x940   :  { %v3473_v20 = vadd.f32 %v3961_v29, %v787_v19 }
 0x941   :  { %3582 = vtanh.f32 %v3472_v18  ;;  %v2863_v23 = vmul.f32 -1.442695, %v3472_v18 }
 0x942   :  { %3584 = vtanh.f32 %v3473_v20  ;;  %v2862_v24 = vmul.f32 -1.442695, %v3473_v20 }
 0x943   :  { %3586 = vpow2.f32 %v2863_v23 }
 0x944   :  { %3588 = vpow2.f32 %v2862_v24 }
 0x94b   :  { %v3583_v21 = vpop.eup %3582 }
 0x94c   :  { %v3585_v22 = vpop.eup %3584  ;;  %818 = vrot.lane.b32.xlu1 %v3583_v21, %s3783_s29 }
 0x94d   :  { %816 = vrot.lane.b32.xlu0 %v3585_v22, %s3783_s29  ;;  %v3587_v25 = vpop.eup %3586 }
 0x94e   :  { %v3589_v26 = vpop.eup %3588  ;;  %v805_v27 = vadd.f32 1.0, %v3587_v25 }
 0x94f   :  { %v804_v28 = vadd.f32 1.0, %v3589_v26 }
 0x950   :  { %3590 = vrcp.f32 %v805_v27 }
 0x951   :  { %3592 = vrcp.f32 %v804_v28 }
 0x95a   :  { %v3591_v30 = vpop.eup %3590 }
 0x95b   :  { %v3593_v32 = vpop.eup %3592  ;;  %v813_v36 = vmul.f32 %v3591_v30, %v692_v2 }
 0x95c   :  { %v812_v38 = vmul.f32 %v3593_v32, %v691_v4 }
 0x9be   :  { %v819_v31 = vpop.permute.xlu1 %818 }
 0x9bf   :  { %v823_v33 = vmul.f32 %v3591_v30, %v819_v31  ;;  %v817_v34 = vpop.permute.xlu0 %816 }
 0x9c0   :  { %v822_v35 = vmul.f32 %v3593_v32, %v817_v34 }
 0x9c1   :  { %828 = vrot.lane.b32.xlu1 %v823_v33, %s3782_s2 }
 0x9c2   :  { %826 = vrot.lane.b32.xlu0 %v822_v35, %s3782_s2 }
 0xa33   :  { %v829_v37 = vpop.permute.xlu1 %828 }
 0xa34   :  { %v833_v39 = vadd.f32 %v829_v37, %v813_v36  ;;  %v827_v40 = vpop.permute.xlu0 %826 }
 0xa35   :  { %v832_v41 = vadd.f32 %v827_v40, %v812_v38 }
 0xa36   :  { %3594 = vtanh.f32 %v833_v39 }
 0xa37   :  { %3596 = vtanh.f32 %v832_v41 }
 0xa40   :  { %v3595_v42 = vpop.eup %3594 }
 0xa41   :  { %v3597_v43 = vpop.eup %3596  ;;  %840 = vrot.lane.b32.xlu1 %v3595_v42, %s3783_s29 }
 0xa42   :  { %838 = vrot.lane.b32.xlu0 %v3597_v43, %s3783_s29 }
 0xab3   :  { %v841_v44 = vpop.permute.xlu1 %840 }
 0xab4   :  { %v845_v45 = vmul.f32 %v3591_v30, %v841_v44  ;;  %v839_v46 = vpop.permute.xlu0 %838 }
 0xab5   :  { %v844_v47 = vmul.f32 %v3593_v32, %v839_v46 }
 0xab6   :  { %850 = vrot.lane.b32.xlu1 %v845_v45, %s3782_s2 }
 0xab7   :  { %848 = vrot.lane.b32.xlu0 %v844_v47, %s3782_s2 }
 0xb28   :  { %v851_v48 = vpop.permute.xlu1 %850 }
 0xb29   :  { %855 = vst.msk [vmem:[#allocation3 + $0x38] sm:$0xff] %vm283_vm1, %v851_v48  ;;  %v849_v49 = vpop.permute.xlu0 %848 }
 0xb2a   :  { %854 = vst.msk [vmem:[#allocation3 + $0x30] sm:$0xff] %vm283_vm1, %v849_v49  ;;  %3153 = vmatprep.mubr.msk.f32.mxu0 %vm283_vm1, %v849_v49 }
 0xb2b   :  { %3154 = vmatmul.mubr.msk.f32.vlgmr.msra.gmra.mrb[8].mxu0 %vm283_vm1, %v851_v48 }
 0xb2c   :  { %3367 = vmatpush3.bf16.msra.mxu0 %v3863_v6 }
 0xb2d   :  { %3369 = vmatprep.subr.bf16.mxu0 %v3878_v11 }
 0xb30   :  { %3371 = vmatpush3.bf16.msra.mxu0 %v3878_v11  ;;  %v1427_v51 = vld [vmem:[#allocation3 + $0x38] sm:$0xff] }
 0xb31   :  { %v1426_v50 = vld [vmem:[#allocation3 + $0x30] sm:$0xff]  ;;  %3373 = vmatprep.subr.bf16.mxu0 %v3863_v6 }
 0xb32   :  { %3206 = vmatprep.mubr.msk.f32.mxu1 %vm283_vm1, %v1426_v50 }
 0xb33   :  { %3207 = vmatmul.mubr.msk.f32.gmra.mrb[6].mxu1 %vm283_vm1, %v1427_v51 }
 0xbfe   :  { %v3155_v52 = vpop.f32.mrb[8].mxu0 }
 0xbff   :  { %v3474_v53 = vadd.f32 %v3155_v52, %v3961_v29  ;;  %v928_v54 = vpop.f32.mrb[9].mxu0 }
 0xc00   :  { %v3475_v55 = vadd.f32 %v3961_v29, %v928_v54 }
 0xc01   :  { %3598 = vtanh.f32 %v3474_v53  ;;  %v2867_v58 = vmul.f32 -1.442695, %v3474_v53 }
 0xc02   :  { %3600 = vtanh.f32 %v3475_v55  ;;  %v2866_v59 = vmul.f32 -1.442695, %v3475_v55 }
 0xc03   :  { %3602 = vpow2.f32 %v2867_v58 }
 0xc04   :  { %3604 = vpow2.f32 %v2866_v59 }
 0xc0b   :  { %v3599_v56 = vpop.eup %3598 }
 0xc0c   :  { %v3601_v57 = vpop.eup %3600  ;;  %959 = vrot.lane.b32.xlu1 %v3599_v56, %s3783_s29 }
 0xc0d   :  { %957 = vrot.lane.b32.xlu0 %v3601_v57, %s3783_s29  ;;  %v3603_v60 = vpop.eup %3602 }
 0xc0e   :  { %v3605_v61 = vpop.eup %3604  ;;  %v946_v62 = vadd.f32 1.0, %v3603_v60 }
 0xc0f   :  { %v945_v63 = vadd.f32 1.0, %v3605_v61 }
 0xc10   :  { %3606 = vrcp.f32 %v946_v62 }
 0xc11   :  { %3608 = vrcp.f32 %v945_v63 }
 0xc1a   :  { %v3607_v0 = vpop.eup %3606 }
 0xc1b   :  { %v3609_v2 = vpop.eup %3608  ;;  %v954_v7 = vmul.f32 %v3607_v0, %v833_v39 }
 0xc1c   :  { %v953_v9 = vmul.f32 %v3609_v2, %v832_v41 }
 0xc7e   :  { %v960_v1 = vpop.permute.xlu1 %959 }
 0xc7f   :  { %v964_v3 = vmul.f32 %v3607_v0, %v960_v1  ;;  %v958_v4 = vpop.permute.xlu0 %957 }
 0xc80   :  { %v963_v5 = vmul.f32 %v3609_v2, %v958_v4 }
 0xc81   :  { %969 = vrot.lane.b32.xlu1 %v964_v3, %s3782_s2 }
 0xc82   :  { %967 = vrot.lane.b32.xlu0 %v963_v5, %s3782_s2 }
 0xcf3   :  { %v970_v8 = vpop.permute.xlu1 %969 }
 0xcf4   :  { %v974_v10 = vadd.f32 %v970_v8, %v954_v7  ;;  %v968_v12 = vpop.permute.xlu0 %967 }
 0xcf5   :  { %v973_v13 = vadd.f32 %v968_v12, %v953_v9 }
 0xcf6   :  { %3610 = vtanh.f32 %v974_v10 }
 0xcf7   :  { %3612 = vtanh.f32 %v973_v13 }
 0xd00   :  { %v3611_v14 = vpop.eup %3610 }
 0xd01   :  { %v3613_v15 = vpop.eup %3612  ;;  %981 = vrot.lane.b32.xlu1 %v3611_v14, %s3783_s29 }
 0xd02   :  { %979 = vrot.lane.b32.xlu0 %v3613_v15, %s3783_s29 }
 0xd73   :  { %v982_v16 = vpop.permute.xlu1 %981 }
 0xd74   :  { %v986_v17 = vmul.f32 %v3607_v0, %v982_v16  ;;  %v980_v18 = vpop.permute.xlu0 %979 }
 0xd75   :  { %v985_v19 = vmul.f32 %v3609_v2, %v980_v18 }
 0xd76   :  { %991 = vrot.lane.b32.xlu1 %v986_v17, %s3782_s2 }
 0xd77   :  { %989 = vrot.lane.b32.xlu0 %v985_v19, %s3782_s2 }
 0xde8   :  { %v992_v20 = vpop.permute.xlu1 %991 }
 0xde9   :  { %996 = vst.msk [vmem:[#allocation3 + $0x48] sm:$0xff] %vm283_vm1, %v992_v20  ;;  %v990_v21 = vpop.permute.xlu0 %989 }
 0xdea   :  { %995 = vst.msk [vmem:[#allocation3 + $0x40] sm:$0xff] %vm283_vm1, %v990_v21  ;;  %3164 = vmatprep.mubr.msk.f32.mxu0 %vm283_vm1, %v990_v21 }
 0xdeb   :  { %3165 = vmatmul.mubr.msk.f32.vlgmr.msra.gmra.mrb[10].mxu0 %vm283_vm1, %v992_v20 }
 0xdec   :  { %3375 = vmatpush3.bf16.msra.mxu0 %v3863_v6 }
 0xded   :  { %3377 = vmatprep.subr.bf16.mxu0 %v3878_v11 }
 0xdf0   :  { %3379 = vmatpush3.bf16.msra.mxu0 %v3878_v11  ;;  %v1429_v23 = vld [vmem:[#allocation3 + $0x48] sm:$0xff] }
 0xdf1   :  { %v1428_v22 = vld [vmem:[#allocation3 + $0x40] sm:$0xff]  ;;  %3381 = vmatprep.subr.bf16.mxu0 %v3863_v6 }
 0xdf2   :  { %3209 = vmatprep.mubr.msk.f32.mxu1 %vm283_vm1, %v1428_v22 }
 0xdf3   :  { %3210 = vmatmul.mubr.msk.f32.gmra.mrb[8].mxu1 %vm283_vm1, %v1429_v23 }
 0xebe   :  { %v3166_v24 = vpop.f32.mrb[10].mxu0 }
 0xebf   :  { %v3476_v25 = vadd.f32 %v3166_v24, %v3961_v29  ;;  %v1069_v26 = vpop.f32.mrb[11].mxu0 }
 0xec0   :  { %v3477_v27 = vadd.f32 %v3961_v29, %v1069_v26 }
 0xec1   :  { %3614 = vtanh.f32 %v3476_v25  ;;  %v2871_v31 = vmul.f32 -1.442695, %v3476_v25 }
 0xec2   :  { %3616 = vtanh.f32 %v3477_v27  ;;  %v2870_v32 = vmul.f32 -1.442695, %v3477_v27 }
 0xec3   :  { %3618 = vpow2.f32 %v2871_v31 }
 0xec4   :  { %3620 = vpow2.f32 %v2870_v32 }
 0xecb   :  { %v3615_v28 = vpop.eup %3614 }
 0xecc   :  { %v3617_v30 = vpop.eup %3616  ;;  %1100 = vrot.lane.b32.xlu1 %v3615_v28, %s3783_s29 }
 0xecd   :  { %1098 = vrot.lane.b32.xlu0 %v3617_v30, %s3783_s29  ;;  %v3619_v33 = vpop.eup %3618 }
 0xece   :  { %v3621_v34 = vpop.eup %3620  ;;  %v1087_v35 = vadd.f32 1.0, %v3619_v33 }
 0xecf   :  { %v1086_v36 = vadd.f32 1.0, %v3621_v34 }
 0xed0   :  { %3622 = vrcp.f32 %v1087_v35 }
 0xed1   :  { %3624 = vrcp.f32 %v1086_v36 }
 0xeda   :  { %v3623_v37 = vpop.eup %3622 }
 0xedb   :  { %v3625_v39 = vpop.eup %3624  ;;  %v1095_v43 = vmul.f32 %v3623_v37, %v974_v10 }
 0xedc   :  { %v1094_v45 = vmul.f32 %v3625_v39, %v973_v13 }
 0xf3e   :  { %v1101_v38 = vpop.permute.xlu1 %1100 }
 0xf3f   :  { %v1105_v40 = vmul.f32 %v3623_v37, %v1101_v38  ;;  %v1099_v41 = vpop.permute.xlu0 %1098 }
 0xf40   :  { %v1104_v42 = vmul.f32 %v3625_v39, %v1099_v41 }
 0xf41   :  { %1110 = vrot.lane.b32.xlu1 %v1105_v40, %s3782_s2 }
 0xf42   :  { %1108 = vrot.lane.b32.xlu0 %v1104_v42, %s3782_s2 }
 0xfb3   :  { %v1111_v44 = vpop.permute.xlu1 %1110 }
 0xfb4   :  { %v1115_v46 = vadd.f32 %v1111_v44, %v1095_v43  ;;  %v1109_v47 = vpop.permute.xlu0 %1108 }
 0xfb5   :  { %v1114_v48 = vadd.f32 %v1109_v47, %v1094_v45 }
 0xfb6   :  { %3626 = vtanh.f32 %v1115_v46 }
 0xfb7   :  { %3628 = vtanh.f32 %v1114_v48 }
 0xfc0   :  { %v3627_v49 = vpop.eup %3626 }
 0xfc1   :  { %v3629_v50 = vpop.eup %3628  ;;  %1122 = vrot.lane.b32.xlu1 %v3627_v49, %s3783_s29 }
 0xfc2   :  { %1120 = vrot.lane.b32.xlu0 %v3629_v50, %s3783_s29 }
0x1033   :  { %v1123_v51 = vpop.permute.xlu1 %1122 }
0x1034   :  { %v1127_v52 = vmul.f32 %v3623_v37, %v1123_v51  ;;  %v1121_v53 = vpop.permute.xlu0 %1120 }
0x1035   :  { %v1126_v54 = vmul.f32 %v3625_v39, %v1121_v53  ;;  %v1656_v53 = vld [vmem:[%s4316_s5] sm:$0xff] }
0x1036   :  { %1132 = vrot.lane.b32.xlu1 %v1127_v52, %s3782_s2 }
0x1037   :  { %1130 = vrot.lane.b32.xlu0 %v1126_v54, %s3782_s2  ;;  %v1657_v54 = vld [vmem:[%s4316_s5 + $0x8] sm:$0xff] }
0x10a8   :  { %v1133_v55 = vpop.permute.xlu1 %1132 }
0x10a9   :  { %1137 = vst.msk [vmem:[#allocation3 + $0x58] sm:$0xff] %vm283_vm1, %v1133_v55  ;;  %v1131_v56 = vpop.permute.xlu0 %1130 }
0x10aa   :  { %1136 = vst.msk [vmem:[#allocation3 + $0x50] sm:$0xff] %vm283_vm1, %v1131_v56  ;;  %3175 = vmatprep.mubr.msk.f32.mxu0 %vm283_vm1, %v1131_v56  ;;  %v4133_v56 = vpack.c.bf16 %v1657_v54, %v1656_v53 }
0x10ab   :  { %3176 = vmatmul.mubr.msk.f32.vlgmr.msra.gmra.mrb[12].mxu0 %vm283_vm1, %v1133_v55  ;;  %v1658_v55 = vld [vmem:[%s4316_s5 + $0x10] sm:$0xff] }
0x10ac   :  { %3383 = vmatpush3.bf16.msra.mxu0 %v3863_v6  ;;  %3397 = vmatprep.subr.bf16.mxu1 %v4133_v56 }
0x10ad   :  { %3385 = vmatprep.subr.bf16.mxu0 %v3878_v11  ;;  %3399 = vmatpush3.bf16.msra.mxu1 %v4133_v56 }
0x10b0   :  { %3387 = vmatpush3.bf16.msra.mxu0 %v3878_v11  ;;  %v1431_v58 = vld [vmem:[#allocation3 + $0x58] sm:$0xff] }
0x10b1   :  { %v1430_v57 = vld [vmem:[#allocation3 + $0x50] sm:$0xff] }
0x10b2   :  { %3212 = vmatprep.mubr.msk.f32.mxu1 %vm283_vm1, %v1430_v57  ;;  %v1659_v57 = vld [vmem:[%s4316_s5 + $0x18] sm:$0xff] }
0x10b3   :  { %3213 = vmatmul.mubr.msk.f32.gmra.mrb[10].mxu1 %vm283_vm1, %v1431_v58  ;;  %v4138_v58 = vpack.c.bf16 %v1659_v57, %v1658_v55 }
0x10b5   :  { %3401 = vmatprep.subr.bf16.mxu1 %v4138_v58 }
0x10b6   :  { %3403 = vmatpush3.bf16.msra.mxu1 %v4138_v58 }
0x10b7   :  { %3405 = vmatprep.subr.bf16.mxu1 %v4133_v56 }
0x117e   :  { %v3177_v59 = vpop.f32.mrb[12].mxu0 }
0x117f   :  { %v3478_v60 = vadd.f32 %v3177_v59, %v3961_v29  ;;  %v1210_v61 = vpop.f32.mrb[13].mxu0 }
0x1180   :  { %v3479_v62 = vadd.f32 %v3961_v29, %v1210_v61 }
0x1181   :  { %3630 = vtanh.f32 %v3478_v60  ;;  %v2875_v11 = vmul.f32 -1.442695, %v3478_v60 }
0x1182   :  { %3632 = vtanh.f32 %v3479_v62  ;;  %v2874_v0 = vmul.f32 -1.442695, %v3479_v62 }
0x1183   :  { %3634 = vpow2.f32 %v2875_v11 }
0x1184   :  { %3636 = vpow2.f32 %v2874_v0 }
0x118b   :  { %v3631_v63 = vpop.eup %3630 }
0x118c   :  { %v3633_v6 = vpop.eup %3632  ;;  %1241 = vrot.lane.b32.xlu1 %v3631_v63, %s3783_s29 }
0x118d   :  { %1239 = vrot.lane.b32.xlu0 %v3633_v6, %s3783_s29  ;;  %v3635_v1 = vpop.eup %3634 }
0x118e   :  { %v3637_v2 = vpop.eup %3636  ;;  %v1228_v3 = vadd.f32 1.0, %v3635_v1 }
0x118f   :  { %v1227_v4 = vadd.f32 1.0, %v3637_v2  ;;  %v2897_v2 = vld [vmem:[%s4313_s7 + $0x10] sm:$0xff] }
0x1190   :  { %3638 = vrcp.f32 %v1228_v3 }
0x1191   :  { %3640 = vrcp.f32 %v1227_v4  ;;  %v2898_v4 = vld [vmem:[%s4313_s7 + $0x18] sm:$0xff] }
0x119a   :  { %v3639_v5 = vpop.eup %3638 }
0x119b   :  { %v3641_v8 = vpop.eup %3640  ;;  %v1236_v13 = vmul.f32 %v3639_v5, %v1115_v46 }
0x119c   :  { %v1235_v15 = vmul.f32 %v3641_v8, %v1114_v48 }
0x11fe   :  { %v1242_v7 = vpop.permute.xlu1 %1241 }
0x11ff   :  { %v1246_v9 = vmul.f32 %v3639_v5, %v1242_v7  ;;  %v1240_v10 = vpop.permute.xlu0 %1239 }
0x1200   :  { %v1245_v12 = vmul.f32 %v3641_v8, %v1240_v10 }
0x1201   :  { %1251 = vrot.lane.b32.xlu1 %v1246_v9, %s3782_s2 }
0x1202   :  { %1249 = vrot.lane.b32.xlu0 %v1245_v12, %s3782_s2 }
0x1273   :  { %v1252_v14 = vpop.permute.xlu1 %1251 }
0x1274   :  { %v1256_v16 = vadd.f32 %v1252_v14, %v1236_v13  ;;  %v1250_v17 = vpop.permute.xlu0 %1249  ;;  %v2900_v14 = vld [vmem:[%s4312_s8 + $0x18] sm:$0xff] }
0x1275   :  { %v1255_v18 = vadd.f32 %v1250_v17, %v1235_v15  ;;  %v2899_v15 = vld [vmem:[%s4312_s8 + $0x10] sm:$0xff] }
0x1276   :  { %3642 = vtanh.f32 %v1256_v16 }
0x1277   :  { %3644 = vtanh.f32 %v1255_v18 }
0x1280   :  { %v3643_v19 = vpop.eup %3642 }
0x1281   :  { %v3645_v20 = vpop.eup %3644  ;;  %1263 = vrot.lane.b32.xlu1 %v3643_v19, %s3783_s29 }
0x1282   :  { %1261 = vrot.lane.b32.xlu0 %v3645_v20, %s3783_s29 }
0x12f3   :  { %v1264_v21 = vpop.permute.xlu1 %1263 }
0x12f4   :  { %v1268_v22 = vmul.f32 %v3639_v5, %v1264_v21  ;;  %v1262_v23 = vpop.permute.xlu0 %1261  ;;  %v4168_v5 = vld [vmem:[%s4317_s6] ss:$0 sm:$0xff] }
0x12f5   :  { %v1267_v24 = vmul.f32 %v3641_v8, %v1262_v23 }
0x12f6   :  { %1273 = vrot.lane.b32.xlu1 %v1268_v22, %s3782_s2 }
0x12f7   :  { %1271 = vrot.lane.b32.xlu0 %v1267_v24, %s3782_s2 }
0x1368   :  { %v1274_v25 = vpop.permute.xlu1 %1273 }
0x1369   :  { %1278 = vst.msk [vmem:[#allocation3 + $0x68] sm:$0xff] %vm283_vm1, %v1274_v25  ;;  %v1272_v26 = vpop.permute.xlu0 %1271 }
0x136a   :  { %1277 = vst.msk [vmem:[#allocation3 + $0x60] sm:$0xff] %vm283_vm1, %v1272_v26  ;;  %3186 = vmatprep.mubr.msk.f32.mxu0 %vm283_vm1, %v1272_v26 }
0x136b   :  { %3187 = vmatmul.mubr.msk.f32.vlgmr.msra.gmra.mrb[14].mxu0 %vm283_vm1, %v1274_v25 }
0x1370   :  { %v1433_v28 = vld [vmem:[#allocation3 + $0x68] sm:$0xff] }
0x1371   :  { %v1432_v27 = vld [vmem:[#allocation3 + $0x60] sm:$0xff] }
0x1372   :  { %3215 = vmatprep.mubr.msk.f32.mxu1 %vm283_vm1, %v1432_v27 }
0x1373   :  { %3216 = vmatmul.mubr.msk.f32.gmra.mrb[12].mxu1 %vm283_vm1, %v1433_v28 }
0x143e   :  { %v3188_v30 = vpop.f32.mrb[14].mxu0 }
0x143f   :  { %v3480_v31 = vadd.f32 %v3188_v30, %v3961_v29  ;;  %v1351_v32 = vpop.f32.mrb[15].mxu0 }
0x1440   :  { %v3481_v33 = vadd.f32 %v3961_v29, %v1351_v32 }
0x1441   :  { %3646 = vtanh.f32 %v3480_v31  ;;  %v2879_v36 = vmul.f32 -1.442695, %v3480_v31 }
0x1442   :  { %3648 = vtanh.f32 %v3481_v33  ;;  %v2878_v37 = vmul.f32 -1.442695, %v3481_v33 }
0x1443   :  { %3650 = vpow2.f32 %v2879_v36 }
0x1444   :  { %3652 = vpow2.f32 %v2878_v37 }
0x144b   :  { %v3647_v34 = vpop.eup %3646 }
0x144c   :  { %v3649_v35 = vpop.eup %3648  ;;  %1382 = vrot.lane.b32.xlu1 %v3647_v34, %s3783_s29 }
0x144d   :  { %1380 = vrot.lane.b32.xlu0 %v3649_v35, %s3783_s29  ;;  %v3651_v38 = vpop.eup %3650 }
0x144e   :  { %v3653_v39 = vpop.eup %3652  ;;  %v1369_v40 = vadd.f32 1.0, %v3651_v38 }
0x144f   :  { %v1368_v41 = vadd.f32 1.0, %v3653_v39 }
0x1450   :  { %3654 = vrcp.f32 %v1369_v40 }
0x1451   :  { %3656 = vrcp.f32 %v1368_v41 }
0x145a   :  { %v3655_v42 = vpop.eup %3654 }
0x145b   :  { %v3657_v43 = vpop.eup %3656  ;;  %v1377_v47 = vmul.f32 %v3655_v42, %v1256_v16 }
0x145c   :  { %v1376_v49 = vmul.f32 %v3657_v43, %v1255_v18 }
0x14be   :  { %v1383_v29 = vpop.permute.xlu1 %1382 }
0x14bf   :  { %v1387_v44 = vmul.f32 %v3655_v42, %v1383_v29  ;;  %v1381_v45 = vpop.permute.xlu0 %1380 }
0x14c0   :  { %v1386_v46 = vmul.f32 %v3657_v43, %v1381_v45 }
0x14c1   :  { %1392 = vrot.lane.b32.xlu1 %v1387_v44, %s3782_s2 }
0x14c2   :  { %1390 = vrot.lane.b32.xlu0 %v1386_v46, %s3782_s2 }
0x1533   :  { %v1393_v48 = vpop.permute.xlu1 %1392 }
0x1534   :  { %v1397_v50 = vadd.f32 %v1393_v48, %v1377_v47  ;;  %v1391_v51 = vpop.permute.xlu0 %1390 }
0x1535   :  { %v1396_v52 = vadd.f32 %v1391_v51, %v1376_v49 }
0x1536   :  { %3658 = vtanh.f32 %v1397_v50 }
0x1537   :  { %3660 = vtanh.f32 %v1396_v52 }
0x1540   :  { %v3659_v59 = vpop.eup %3658 }
0x1541   :  { %v3661_v60 = vpop.eup %3660  ;;  %1404 = vrot.lane.b32.xlu1 %v3659_v59, %s3783_s29 }
0x1542   :  { %1402 = vrot.lane.b32.xlu0 %v3661_v60, %s3783_s29 }
0x15b3   :  { %v1405_v61 = vpop.permute.xlu1 %1404 }
0x15b4   :  { %v1409_v62 = vmul.f32 %v3655_v42, %v1405_v61  ;;  %v1403_v63 = vpop.permute.xlu0 %1402 }
0x15b5   :  { %v1408_v6 = vmul.f32 %v3657_v43, %v1403_v63 }
0x15b6   :  { %1414 = vrot.lane.b32.xlu1 %v1409_v62, %s3782_s2 }
0x15b7   :  { %1412 = vrot.lane.b32.xlu0 %v1408_v6, %s3782_s2 }
0x1628   :  { %v1415_v11 = vpop.permute.xlu1 %1414 }
0x1629   :  { %1419 = vst.msk [vmem:[#allocation3 + $0x78] sm:$0xff] %vm283_vm1, %v1415_v11  ;;  %v1413_v0 = vpop.permute.xlu0 %1412 }
0x162a   :  { %1418 = vst.msk [vmem:[#allocation3 + $0x70] sm:$0xff] %vm283_vm1, %v1413_v0 }
0x1630   :  { %v1435_v3 = vld [vmem:[#allocation3 + $0x78] sm:$0xff] }
0x1631   :  { %v1434_v1 = vld [vmem:[#allocation3 + $0x70] sm:$0xff] }
0x1632   :  { %3218 = vmatprep.mubr.msk.f32.mxu1 %vm283_vm1, %v1434_v1 }
0x1633   :  { %3219 = vmatmul.mubr.msk.f32.gmra.mrb[14].mxu1 %vm283_vm1, %v1435_v3 }
0x1634   :  { %3229 = vmatprep.mubr.msk.f32.mxu1 %vm283_vm1, %v2897_v2 }
0x1637   :  { %3230 = vmatmul.mubr.msk.f32.vlgmr.msra.gmra.mrb[0].mxu1 %vm283_vm1, %v2898_v4 }
0x1638   :  { %3407 = vmatpush3.bf16.msra.mxu1 %v4133_v56 }
0x1639   :  { %3409 = vmatprep.subr.bf16.mxu1 %v4138_v58 }
0x163c   :  { %3411 = vmatpush3.bf16.msra.mxu1 %v4138_v58 }
0x163d   :  { %3413 = vmatprep.subr.bf16.mxu1 %v4133_v56 }
0x170a   :  { %v3231_v7 = vpop.f32.mrb[0].mxu1 }
0x170b   :  { %v3482_v8 = vadd.f32 %v3231_v7, %v4168_v5  ;;  %v1740_v9 = vpop.f32.mrb[1].mxu1 }
0x170c   :  { %v3483_v10 = vadd.f32 %v4168_v5, %v1740_v9 }
0x170d   :  { %3662 = vtanh.f32 %v3482_v8  ;;  %v2904_v16 = vmul.f32 -1.442695, %v3482_v8 }
0x170e   :  { %3664 = vtanh.f32 %v3483_v10  ;;  %v2903_v17 = vmul.f32 -1.442695, %v3483_v10 }
0x170f   :  { %3666 = vpow2.f32 %v2904_v16 }
0x1710   :  { %3668 = vpow2.f32 %v2903_v17 }
0x1717   :  { %v3663_v12 = vpop.eup %3662 }
0x1718   :  { %v3665_v13 = vpop.eup %3664  ;;  %1779 = vrot.lane.b32.xlu1 %v3663_v12, %s3783_s29 }
0x1719   :  { %1777 = vrot.lane.b32.xlu0 %v3665_v13, %s3783_s29  ;;  %v3667_v18 = vpop.eup %3666 }
0x171a   :  { %v3669_v19 = vpop.eup %3668  ;;  %v1758_v20 = vadd.f32 1.0, %v3667_v18 }
0x171b   :  { %v1757_v21 = vadd.f32 1.0, %v3669_v19 }
0x171c   :  { %1769 = vrot.lane.b32.xlu1 %v2900_v14, %s3782_s2  ;;  %3670 = vrcp.f32 %v1758_v20 }
0x171d   :  { %1767 = vrot.lane.b32.xlu0 %v2899_v15, %s3782_s2  ;;  %3672 = vrcp.f32 %v1757_v21 }
0x1726   :  { %v3671_v22 = vpop.eup %3670 }
0x1727   :  { %v3673_v24 = vpop.eup %3672 }
0x178a   :  { %v1780_v23 = vpop.permute.xlu1 %1779 }
0x178b   :  { %v1784_v25 = vmul.f32 %v3671_v22, %v1780_v23  ;;  %v1778_v26 = vpop.permute.xlu0 %1777 }
0x178c   :  { %v1783_v27 = vmul.f32 %v3673_v24, %v1778_v26 }
0x178d   :  { %1789 = vrot.lane.b32.xlu1 %v1784_v25, %s3782_s2 }
0x178e   :  { %1787 = vrot.lane.b32.xlu0 %v1783_v27, %s3782_s2  ;;  %v1770_v28 = vpop.permute.xlu1 %1769 }
0x178f   :  { %v1768_v30 = vpop.permute.xlu0 %1767  ;;  %v1774_v31 = vmul.f32 %v3671_v22, %v1770_v28 }
0x1790   :  { %v1773_v32 = vmul.f32 %v3673_v24, %v1768_v30 }
0x17ff   :  { %v1790_v33 = vpop.permute.xlu1 %1789 }
0x1800   :  { %v1794_v34 = vadd.f32 %v1790_v33, %v1774_v31  ;;  %v1788_v35 = vpop.permute.xlu0 %1787 }
0x1801   :  { %v1793_v36 = vadd.f32 %v1788_v35, %v1773_v32 }
0x1802   :  { %3674 = vtanh.f32 %v1794_v34 }
0x1803   :  { %3676 = vtanh.f32 %v1793_v36 }
0x180c   :  { %v3675_v37 = vpop.eup %3674 }
0x180d   :  { %v3677_v38 = vpop.eup %3676  ;;  %1801 = vrot.lane.b32.xlu1 %v3675_v37, %s3783_s29 }
0x180e   :  { %1799 = vrot.lane.b32.xlu0 %v3677_v38, %s3783_s29 }
0x187f   :  { %v1802_v39 = vpop.permute.xlu1 %1801 }
0x1880   :  { %v1806_v40 = vmul.f32 %v3671_v22, %v1802_v39  ;;  %v1800_v41 = vpop.permute.xlu0 %1799 }
0x1881   :  { %v1805_v42 = vmul.f32 %v3673_v24, %v1800_v41 }
0x1882   :  { %1813 = vrot.lane.b32.xlu1 %v1806_v40, %s3782_s2 }
0x1883   :  { %1811 = vrot.lane.b32.xlu0 %v1805_v42, %s3782_s2 }
0x18f4   :  { %v1814_v43 = vpop.permute.xlu1 %1813 }
0x18f5   :  { %v1812_v29 = vpop.permute.xlu0 %1811 }
0x18f6   :  { %3240 = vmatprep.mubr.msk.f32.mxu1 %vm283_vm1, %v1812_v29 }
0x18f7   :  { %3241 = vmatmul.mubr.msk.f32.vlgmr.msra.gmra.mrb[2].mxu1 %vm283_vm1, %v1814_v43 }
0x18f8   :  { %3415 = vmatpush3.bf16.msra.mxu1 %v4133_v56 }
0x18f9   :  { %3417 = vmatprep.subr.bf16.mxu1 %v4138_v58 }
0x18fc   :  { %3419 = vmatpush3.bf16.msra.mxu1 %v4138_v58 }
0x18fd   :  { %3421 = vmatprep.subr.bf16.mxu1 %v4133_v56 }
0x19ca   :  { %v3242_v44 = vpop.f32.mrb[2].mxu1 }
0x19cb   :  { %v3484_v45 = vadd.f32 %v3242_v44, %v4168_v5  ;;  %v1885_v46 = vpop.f32.mrb[3].mxu1 }
0x19cc   :  { %v3485_v47 = vadd.f32 %v4168_v5, %v1885_v46 }
0x19cd   :  { %3678 = vtanh.f32 %v3484_v45  ;;  %v2908_v50 = vmul.f32 -1.442695, %v3484_v45 }
0x19ce   :  { %3680 = vtanh.f32 %v3485_v47  ;;  %v2907_v51 = vmul.f32 -1.442695, %v3485_v47 }
0x19cf   :  { %3682 = vpow2.f32 %v2908_v50 }
0x19d0   :  { %3684 = vpow2.f32 %v2907_v51 }
0x19d7   :  { %v3679_v48 = vpop.eup %3678 }
0x19d8   :  { %v3681_v49 = vpop.eup %3680  ;;  %1916 = vrot.lane.b32.xlu1 %v3679_v48, %s3783_s29 }
0x19d9   :  { %1914 = vrot.lane.b32.xlu0 %v3681_v49, %s3783_s29  ;;  %v3683_v52 = vpop.eup %3682 }
0x19da   :  { %v3685_v53 = vpop.eup %3684  ;;  %v1903_v54 = vadd.f32 1.0, %v3683_v52 }
0x19db   :  { %v1902_v55 = vadd.f32 1.0, %v3685_v53 }
0x19dc   :  { %3686 = vrcp.f32 %v1903_v54 }
0x19dd   :  { %3688 = vrcp.f32 %v1902_v55 }
0x19e6   :  { %v3687_v57 = vpop.eup %3686 }
0x19e7   :  { %v3689_v60 = vpop.eup %3688  ;;  %v1911_v6 = vmul.f32 %v3687_v57, %v1794_v34 }
0x19e8   :  { %v1910_v0 = vmul.f32 %v3689_v60, %v1793_v36 }
0x1a4a   :  { %v1917_v59 = vpop.permute.xlu1 %1916 }
0x1a4b   :  { %v1921_v61 = vmul.f32 %v3687_v57, %v1917_v59  ;;  %v1915_v62 = vpop.permute.xlu0 %1914 }
0x1a4c   :  { %v1920_v63 = vmul.f32 %v3689_v60, %v1915_v62 }
0x1a4d   :  { %1926 = vrot.lane.b32.xlu1 %v1921_v61, %s3782_s2 }
0x1a4e   :  { %1924 = vrot.lane.b32.xlu0 %v1920_v63, %s3782_s2 }
0x1abf   :  { %v1927_v11 = vpop.permute.xlu1 %1926 }
0x1ac0   :  { %v1931_v1 = vadd.f32 %v1927_v11, %v1911_v6  ;;  %v1925_v2 = vpop.permute.xlu0 %1924 }
0x1ac1   :  { %v1930_v3 = vadd.f32 %v1925_v2, %v1910_v0 }
0x1ac2   :  { %3690 = vtanh.f32 %v1931_v1 }
0x1ac3   :  { %3692 = vtanh.f32 %v1930_v3 }
0x1acc   :  { %v3691_v4 = vpop.eup %3690 }
0x1acd   :  { %v3693_v7 = vpop.eup %3692  ;;  %1938 = vrot.lane.b32.xlu1 %v3691_v4, %s3783_s29 }
0x1ace   :  { %1936 = vrot.lane.b32.xlu0 %v3693_v7, %s3783_s29 }
0x1b3f   :  { %v1939_v8 = vpop.permute.xlu1 %1938 }
0x1b40   :  { %v1943_v9 = vmul.f32 %v3687_v57, %v1939_v8  ;;  %v1937_v10 = vpop.permute.xlu0 %1936 }
0x1b41   :  { %v1942_v12 = vmul.f32 %v3689_v60, %v1937_v10 }
0x1b42   :  { %1950 = vrot.lane.b32.xlu1 %v1943_v9, %s3782_s2 }
0x1b43   :  { %1948 = vrot.lane.b32.xlu0 %v1942_v12, %s3782_s2 }
0x1bb4   :  { %v1951_v14 = vpop.permute.xlu1 %1950 }
0x1bb5   :  { %v1949_v13 = vpop.permute.xlu0 %1948 }
0x1bb6   :  { %3251 = vmatprep.mubr.msk.f32.mxu1 %vm283_vm1, %v1949_v13 }
0x1bb7   :  { %3252 = vmatmul.mubr.msk.f32.vlgmr.msra.gmra.mrb[4].mxu1 %vm283_vm1, %v1951_v14 }
0x1bb8   :  { %3423 = vmatpush3.bf16.msra.mxu1 %v4133_v56 }
0x1bb9   :  { %3425 = vmatprep.subr.bf16.mxu1 %v4138_v58 }
0x1bbc   :  { %3427 = vmatpush3.bf16.msra.mxu1 %v4138_v58 }
0x1bbd   :  { %3429 = vmatprep.subr.bf16.mxu1 %v4133_v56 }
0x1c8a   :  { %v3253_v15 = vpop.f32.mrb[4].mxu1 }
0x1c8b   :  { %v3486_v16 = vadd.f32 %v3253_v15, %v4168_v5  ;;  %v2022_v17 = vpop.f32.mrb[5].mxu1 }
0x1c8c   :  { %v3487_v18 = vadd.f32 %v4168_v5, %v2022_v17 }
0x1c8d   :  { %3694 = vtanh.f32 %v3486_v16  ;;  %v2912_v21 = vmul.f32 -1.442695, %v3486_v16 }
0x1c8e   :  { %3696 = vtanh.f32 %v3487_v18  ;;  %v2911_v22 = vmul.f32 -1.442695, %v3487_v18 }
0x1c8f   :  { %3698 = vpow2.f32 %v2912_v21 }
0x1c90   :  { %3700 = vpow2.f32 %v2911_v22 }
0x1c97   :  { %v3695_v19 = vpop.eup %3694 }
0x1c98   :  { %v3697_v20 = vpop.eup %3696  ;;  %2053 = vrot.lane.b32.xlu1 %v3695_v19, %s3783_s29 }
0x1c99   :  { %2051 = vrot.lane.b32.xlu0 %v3697_v20, %s3783_s29  ;;  %v3699_v23 = vpop.eup %3698 }
0x1c9a   :  { %v3701_v24 = vpop.eup %3700  ;;  %v2040_v25 = vadd.f32 1.0, %v3699_v23 }
0x1c9b   :  { %v2039_v26 = vadd.f32 1.0, %v3701_v24 }
0x1c9c   :  { %3702 = vrcp.f32 %v2040_v25 }
0x1c9d   :  { %3704 = vrcp.f32 %v2039_v26 }
0x1ca6   :  { %v3703_v27 = vpop.eup %3702 }
0x1ca7   :  { %v3705_v30 = vpop.eup %3704  ;;  %v2048_v34 = vmul.f32 %v3703_v27, %v1931_v1 }
0x1ca8   :  { %v2047_v36 = vmul.f32 %v3705_v30, %v1930_v3 }
0x1d0a   :  { %v2054_v28 = vpop.permute.xlu1 %2053 }
0x1d0b   :  { %v2058_v31 = vmul.f32 %v3703_v27, %v2054_v28  ;;  %v2052_v32 = vpop.permute.xlu0 %2051 }
0x1d0c   :  { %v2057_v33 = vmul.f32 %v3705_v30, %v2052_v32 }
0x1d0d   :  { %2063 = vrot.lane.b32.xlu1 %v2058_v31, %s3782_s2 }
0x1d0e   :  { %2061 = vrot.lane.b32.xlu0 %v2057_v33, %s3782_s2 }
0x1d7f   :  { %v2064_v35 = vpop.permute.xlu1 %2063 }
0x1d80   :  { %v2068_v37 = vadd.f32 %v2064_v35, %v2048_v34  ;;  %v2062_v38 = vpop.permute.xlu0 %2061 }
0x1d81   :  { %v2067_v39 = vadd.f32 %v2062_v38, %v2047_v36 }
0x1d82   :  { %3706 = vtanh.f32 %v2068_v37 }
0x1d83   :  { %3708 = vtanh.f32 %v2067_v39 }
0x1d8c   :  { %v3707_v40 = vpop.eup %3706 }
0x1d8d   :  { %v3709_v41 = vpop.eup %3708  ;;  %2075 = vrot.lane.b32.xlu1 %v3707_v40, %s3783_s29 }
0x1d8e   :  { %2073 = vrot.lane.b32.xlu0 %v3709_v41, %s3783_s29 }
0x1dff   :  { %v2076_v42 = vpop.permute.xlu1 %2075 }
0x1e00   :  { %v2080_v29 = vmul.f32 %v3703_v27, %v2076_v42  ;;  %v2074_v43 = vpop.permute.xlu0 %2073 }
0x1e01   :  { %v2079_v44 = vmul.f32 %v3705_v30, %v2074_v43 }
0x1e02   :  { %2087 = vrot.lane.b32.xlu1 %v2080_v29, %s3782_s2 }
0x1e03   :  { %2085 = vrot.lane.b32.xlu0 %v2079_v44, %s3782_s2 }
0x1e74   :  { %v2088_v46 = vpop.permute.xlu1 %2087 }
0x1e75   :  { %v2086_v45 = vpop.permute.xlu0 %2085 }
0x1e76   :  { %3262 = vmatprep.mubr.msk.f32.mxu1 %vm283_vm1, %v2086_v45 }
0x1e77   :  { %3263 = vmatmul.mubr.msk.f32.vlgmr.msra.gmra.mrb[6].mxu1 %vm283_vm1, %v2088_v46 }
0x1e78   :  { %3431 = vmatpush3.bf16.msra.mxu1 %v4133_v56 }
0x1e79   :  { %3433 = vmatprep.subr.bf16.mxu1 %v4138_v58 }
0x1e7c   :  { %3435 = vmatpush3.bf16.msra.mxu1 %v4138_v58 }
0x1e7d   :  { %3437 = vmatprep.subr.bf16.mxu1 %v4133_v56 }
0x1f4a   :  { %v3264_v47 = vpop.f32.mrb[6].mxu1 }
0x1f4b   :  { %v3488_v48 = vadd.f32 %v3264_v47, %v4168_v5  ;;  %v2159_v49 = vpop.f32.mrb[7].mxu1 }
0x1f4c   :  { %v3489_v50 = vadd.f32 %v4168_v5, %v2159_v49 }
0x1f4d   :  { %3710 = vtanh.f32 %v3488_v48  ;;  %v2916_v53 = vmul.f32 -1.442695, %v3488_v48 }
0x1f4e   :  { %3712 = vtanh.f32 %v3489_v50  ;;  %v2915_v54 = vmul.f32 -1.442695, %v3489_v50 }
0x1f4f   :  { %3714 = vpow2.f32 %v2916_v53 }
0x1f50   :  { %3716 = vpow2.f32 %v2915_v54 }
0x1f57   :  { %v3711_v51 = vpop.eup %3710 }
0x1f58   :  { %v3713_v52 = vpop.eup %3712  ;;  %2190 = vrot.lane.b32.xlu1 %v3711_v51, %s3783_s29 }
0x1f59   :  { %2188 = vrot.lane.b32.xlu0 %v3713_v52, %s3783_s29  ;;  %v3715_v55 = vpop.eup %3714 }
0x1f5a   :  { %v3717_v57 = vpop.eup %3716  ;;  %v2177_v59 = vadd.f32 1.0, %v3715_v55 }
0x1f5b   :  { %v2176_v60 = vadd.f32 1.0, %v3717_v57 }
0x1f5c   :  { %3718 = vrcp.f32 %v2177_v59 }
0x1f5d   :  { %3720 = vrcp.f32 %v2176_v60 }
0x1f66   :  { %v3719_v61 = vpop.eup %3718 }
0x1f67   :  { %v3721_v63 = vpop.eup %3720  ;;  %v2185_v1 = vmul.f32 %v3719_v61, %v2068_v37 }
0x1f68   :  { %v2184_v3 = vmul.f32 %v3721_v63, %v2067_v39 }
0x1fca   :  { %v2191_v62 = vpop.permute.xlu1 %2190 }
0x1fcb   :  { %v2195_v6 = vmul.f32 %v3719_v61, %v2191_v62  ;;  %v2189_v11 = vpop.permute.xlu0 %2188 }
0x1fcc   :  { %v2194_v0 = vmul.f32 %v3721_v63, %v2189_v11 }
0x1fcd   :  { %2200 = vrot.lane.b32.xlu1 %v2195_v6, %s3782_s2 }
0x1fce   :  { %2198 = vrot.lane.b32.xlu0 %v2194_v0, %s3782_s2 }
0x203f   :  { %v2201_v2 = vpop.permute.xlu1 %2200 }
0x2040   :  { %v2205_v4 = vadd.f32 %v2201_v2, %v2185_v1  ;;  %v2199_v7 = vpop.permute.xlu0 %2198 }
0x2041   :  { %v2204_v8 = vadd.f32 %v2199_v7, %v2184_v3 }
0x2042   :  { %3722 = vtanh.f32 %v2205_v4 }
0x2043   :  { %3724 = vtanh.f32 %v2204_v8 }
0x204c   :  { %v3723_v9 = vpop.eup %3722 }
0x204d   :  { %v3725_v10 = vpop.eup %3724  ;;  %2212 = vrot.lane.b32.xlu1 %v3723_v9, %s3783_s29 }
0x204e   :  { %2210 = vrot.lane.b32.xlu0 %v3725_v10, %s3783_s29 }
0x20bf   :  { %v2213_v12 = vpop.permute.xlu1 %2212 }
0x20c0   :  { %v2217_v13 = vmul.f32 %v3719_v61, %v2213_v12  ;;  %v2211_v14 = vpop.permute.xlu0 %2210 }
0x20c1   :  { %v2216_v15 = vmul.f32 %v3721_v63, %v2211_v14 }
0x20c2   :  { %2224 = vrot.lane.b32.xlu1 %v2217_v13, %s3782_s2 }
0x20c3   :  { %2222 = vrot.lane.b32.xlu0 %v2216_v15, %s3782_s2 }
0x2134   :  { %v2225_v17 = vpop.permute.xlu1 %2224 }
0x2135   :  { %v2223_v16 = vpop.permute.xlu0 %2222 }
0x2136   :  { %3273 = vmatprep.mubr.msk.f32.mxu1 %vm283_vm1, %v2223_v16 }
0x2137   :  { %3274 = vmatmul.mubr.msk.f32.vlgmr.msra.gmra.mrb[8].mxu1 %vm283_vm1, %v2225_v17 }
0x2138   :  { %3439 = vmatpush3.bf16.msra.mxu1 %v4133_v56 }
0x2139   :  { %3441 = vmatprep.subr.bf16.mxu1 %v4138_v58 }
0x213c   :  { %3443 = vmatpush3.bf16.msra.mxu1 %v4138_v58 }
0x213d   :  { %3445 = vmatprep.subr.bf16.mxu1 %v4133_v56 }
0x220a   :  { %v3275_v18 = vpop.f32.mrb[8].mxu1 }
0x220b   :  { %v3490_v19 = vadd.f32 %v3275_v18, %v4168_v5  ;;  %v2296_v20 = vpop.f32.mrb[9].mxu1 }
0x220c   :  { %v3491_v21 = vadd.f32 %v4168_v5, %v2296_v20 }
0x220d   :  { %3726 = vtanh.f32 %v3490_v19  ;;  %v2920_v24 = vmul.f32 -1.442695, %v3490_v19 }
0x220e   :  { %3728 = vtanh.f32 %v3491_v21  ;;  %v2919_v25 = vmul.f32 -1.442695, %v3491_v21 }
0x220f   :  { %3730 = vpow2.f32 %v2920_v24 }
0x2210   :  { %3732 = vpow2.f32 %v2919_v25 }
0x2217   :  { %v3727_v22 = vpop.eup %3726 }
0x2218   :  { %v3729_v23 = vpop.eup %3728  ;;  %2327 = vrot.lane.b32.xlu1 %v3727_v22, %s3783_s29 }
0x2219   :  { %2325 = vrot.lane.b32.xlu0 %v3729_v23, %s3783_s29  ;;  %v3731_v26 = vpop.eup %3730 }
0x221a   :  { %v3733_v27 = vpop.eup %3732  ;;  %v2314_v28 = vadd.f32 1.0, %v3731_v26 }
0x221b   :  { %v2313_v30 = vadd.f32 1.0, %v3733_v27 }
0x221c   :  { %3734 = vrcp.f32 %v2314_v28 }
0x221d   :  { %3736 = vrcp.f32 %v2313_v30 }
0x2226   :  { %v3735_v31 = vpop.eup %3734 }
0x2227   :  { %v3737_v33 = vpop.eup %3736  ;;  %v2322_v37 = vmul.f32 %v3735_v31, %v2205_v4 }
0x2228   :  { %v2321_v39 = vmul.f32 %v3737_v33, %v2204_v8 }
0x228a   :  { %v2328_v32 = vpop.permute.xlu1 %2327 }
0x228b   :  { %v2332_v34 = vmul.f32 %v3735_v31, %v2328_v32  ;;  %v2326_v35 = vpop.permute.xlu0 %2325 }
0x228c   :  { %v2331_v36 = vmul.f32 %v3737_v33, %v2326_v35 }
0x228d   :  { %2337 = vrot.lane.b32.xlu1 %v2332_v34, %s3782_s2 }
0x228e   :  { %2335 = vrot.lane.b32.xlu0 %v2331_v36, %s3782_s2 }
0x22ff   :  { %v2338_v38 = vpop.permute.xlu1 %2337 }
0x2300   :  { %v2342_v40 = vadd.f32 %v2338_v38, %v2322_v37  ;;  %v2336_v41 = vpop.permute.xlu0 %2335 }
0x2301   :  { %v2341_v42 = vadd.f32 %v2336_v41, %v2321_v39 }
0x2302   :  { %3738 = vtanh.f32 %v2342_v40 }
0x2303   :  { %3740 = vtanh.f32 %v2341_v42 }
0x230c   :  { %v3739_v29 = vpop.eup %3738 }
0x230d   :  { %v3741_v43 = vpop.eup %3740  ;;  %2349 = vrot.lane.b32.xlu1 %v3739_v29, %s3783_s29 }
0x230e   :  { %2347 = vrot.lane.b32.xlu0 %v3741_v43, %s3783_s29 }
0x237f   :  { %v2350_v44 = vpop.permute.xlu1 %2349 }
0x2380   :  { %v2354_v45 = vmul.f32 %v3735_v31, %v2350_v44  ;;  %v2348_v46 = vpop.permute.xlu0 %2347 }
0x2381   :  { %v2353_v47 = vmul.f32 %v3737_v33, %v2348_v46 }
0x2382   :  { %2361 = vrot.lane.b32.xlu1 %v2354_v45, %s3782_s2 }
0x2383   :  { %2359 = vrot.lane.b32.xlu0 %v2353_v47, %s3782_s2 }
0x23f4   :  { %v2362_v49 = vpop.permute.xlu1 %2361 }
0x23f5   :  { %v2360_v48 = vpop.permute.xlu0 %2359 }
0x23f6   :  { %3284 = vmatprep.mubr.msk.f32.mxu1 %vm283_vm1, %v2360_v48 }
0x23f7   :  { %3285 = vmatmul.mubr.msk.f32.vlgmr.msra.gmra.mrb[10].mxu1 %vm283_vm1, %v2362_v49 }
0x23f8   :  { %3447 = vmatpush3.bf16.msra.mxu1 %v4133_v56 }
0x23f9   :  { %3449 = vmatprep.subr.bf16.mxu1 %v4138_v58 }
0x23fc   :  { %3451 = vmatpush3.bf16.msra.mxu1 %v4138_v58 }
0x23fd   :  { %3453 = vmatprep.subr.bf16.mxu1 %v4133_v56 }
0x24ca   :  { %v3286_v50 = vpop.f32.mrb[10].mxu1 }
0x24cb   :  { %v3492_v51 = vadd.f32 %v3286_v50, %v4168_v5  ;;  %v2433_v52 = vpop.f32.mrb[11].mxu1 }
0x24cc   :  { %v3493_v53 = vadd.f32 %v4168_v5, %v2433_v52 }
0x24cd   :  { %3742 = vtanh.f32 %v3492_v51  ;;  %v2924_v57 = vmul.f32 -1.442695, %v3492_v51 }
0x24ce   :  { %3744 = vtanh.f32 %v3493_v53  ;;  %v2923_v59 = vmul.f32 -1.442695, %v3493_v53 }
0x24cf   :  { %3746 = vpow2.f32 %v2924_v57 }
0x24d0   :  { %3748 = vpow2.f32 %v2923_v59 }
0x24d7   :  { %v3743_v54 = vpop.eup %3742 }
0x24d8   :  { %v3745_v55 = vpop.eup %3744  ;;  %2464 = vrot.lane.b32.xlu1 %v3743_v54, %s3783_s29 }
0x24d9   :  { %2462 = vrot.lane.b32.xlu0 %v3745_v55, %s3783_s29  ;;  %v3747_v60 = vpop.eup %3746 }
0x24da   :  { %v3749_v61 = vpop.eup %3748  ;;  %v2451_v62 = vadd.f32 1.0, %v3747_v60 }
0x24db   :  { %v2450_v63 = vadd.f32 1.0, %v3749_v61 }
0x24dc   :  { %3750 = vrcp.f32 %v2451_v62 }
0x24dd   :  { %3752 = vrcp.f32 %v2450_v63 }
0x24e6   :  { %v3751_v6 = vpop.eup %3750 }
0x24e7   :  { %v3753_v0 = vpop.eup %3752  ;;  %v2459_v4 = vmul.f32 %v3751_v6, %v2342_v40 }
0x24e8   :  { %v2458_v8 = vmul.f32 %v3753_v0, %v2341_v42 }
0x254a   :  { %v2465_v11 = vpop.permute.xlu1 %2464 }
0x254b   :  { %v2469_v1 = vmul.f32 %v3751_v6, %v2465_v11  ;;  %v2463_v2 = vpop.permute.xlu0 %2462 }
0x254c   :  { %v2468_v3 = vmul.f32 %v3753_v0, %v2463_v2  ;;  %v2741_v2 = vld [vmem:[%s4318_s9 + $0x10] sm:$0xff] }
0x254d   :  { %2474 = vrot.lane.b32.xlu1 %v2469_v1, %s3782_s2  ;;  %v2740_v1 = vld [vmem:[%s4318_s9 + $0x8] sm:$0xff] }
0x254e   :  { %2472 = vrot.lane.b32.xlu0 %v2468_v3, %s3782_s2  ;;  %v3786_v3 = vmov 0.0  }
0x254f   :  { %3317 = vmatprep.mubr.msk.f32.mxu0 %vm3785_vm2, %v3786_v3 }
0x25bf   :  { %v2475_v7 = vpop.permute.xlu1 %2474 }
0x25c0   :  { %v2479_v9 = vadd.f32 %v2475_v7, %v2459_v4  ;;  %v2473_v10 = vpop.permute.xlu0 %2472  ;;  %v2742_v7 = vld [vmem:[%s4318_s9 + $0x18] sm:$0xff] }
0x25c1   :  { %v2478_v12 = vadd.f32 %v2473_v10, %v2458_v8  ;;  %v3464_v8 = vpack.c.bf16 %v2742_v7, %v2741_v2 }
0x25c2   :  { %3754 = vtanh.f32 %v2479_v9 }
0x25c3   :  { %3756 = vtanh.f32 %v2478_v12 }
0x25cc   :  { %v3755_v13 = vpop.eup %3754 }
0x25cd   :  { %v3757_v14 = vpop.eup %3756  ;;  %2486 = vrot.lane.b32.xlu1 %v3755_v13, %s3783_s29 }
0x25ce   :  { %2484 = vrot.lane.b32.xlu0 %v3757_v14, %s3783_s29  ;;  %v2932_v14 = vld [vmem:[%s4319_s10] ss:$0 sm:$0xff] }
0x263f   :  { %v2487_v15 = vpop.permute.xlu1 %2486 }
0x2640   :  { %v2491_v16 = vmul.f32 %v3751_v6, %v2487_v15  ;;  %v2485_v17 = vpop.permute.xlu0 %2484 }
0x2641   :  { %v2490_v18 = vmul.f32 %v3753_v0, %v2485_v17  ;;  %v3784_v0 = vmov 0.0|0.0  }
0x2642   :  { %2498 = vrot.lane.b32.xlu1 %v2491_v16, %s3782_s2  ;;  %3460 = vmatprep.subr.bf16.mxu0 %v3784_v0 }
0x2643   :  { %2496 = vrot.lane.b32.xlu0 %v2490_v18, %s3782_s2 }
0x26b4   :  { %v2499_v20 = vpop.permute.xlu1 %2498 }
0x26b5   :  { %v2497_v19 = vpop.permute.xlu0 %2496 }
0x26b6   :  { %3295 = vmatprep.mubr.msk.f32.mxu1 %vm283_vm1, %v2497_v19 }
0x26b7   :  { %3296 = vmatmul.mubr.msk.f32.vlgmr.msra.gmra.mrb[12].mxu1 %vm283_vm1, %v2499_v20 }
0x26b8   :  { %3455 = vmatpush3.bf16.msra.mxu1 %v4133_v56 }
0x26b9   :  { %3457 = vmatprep.subr.bf16.mxu1 %v4138_v58 }
0x26bc   :  { %3459 = vmatpush3.bf16.msra.mxu1 %v4138_v58 }
0x278a   :  { %v3297_v21 = vpop.f32.mrb[12].mxu1 }
0x278b   :  { %v3494_v22 = vadd.f32 %v3297_v21, %v4168_v5  ;;  %v2570_v23 = vpop.f32.mrb[13].mxu1 }
0x278c   :  { %v3495_v24 = vadd.f32 %v4168_v5, %v2570_v23 }
0x278d   :  { %3758 = vtanh.f32 %v3494_v22  ;;  %v2928_v27 = vmul.f32 -1.442695, %v3494_v22 }
0x278e   :  { %3760 = vtanh.f32 %v3495_v24  ;;  %v2927_v56 = vmul.f32 -1.442695, %v3495_v24 }
0x278f   :  { %3762 = vpow2.f32 %v2928_v27 }
0x2790   :  { %3764 = vpow2.f32 %v2927_v56 }
0x2797   :  { %v3759_v25 = vpop.eup %3758 }
0x2798   :  { %v3761_v26 = vpop.eup %3760  ;;  %2601 = vrot.lane.b32.xlu1 %v3759_v25, %s3783_s29 }
0x2799   :  { %2599 = vrot.lane.b32.xlu0 %v3761_v26, %s3783_s29  ;;  %v3763_v28 = vpop.eup %3762 }
0x279a   :  { %v3765_v58 = vpop.eup %3764  ;;  %v2588_v30 = vadd.f32 1.0, %v3763_v28 }
0x279b   :  { %v2587_v31 = vadd.f32 1.0, %v3765_v58 }
0x279c   :  { %3766 = vrcp.f32 %v2588_v30 }
0x279d   :  { %3768 = vrcp.f32 %v2587_v31 }
0x27a6   :  { %v3767_v32 = vpop.eup %3766 }
0x27a7   :  { %v3769_v34 = vpop.eup %3768  ;;  %v2596_v38 = vmul.f32 %v3767_v32, %v2479_v9 }
0x27a8   :  { %v2595_v40 = vmul.f32 %v3769_v34, %v2478_v12 }
0x280a   :  { %v2602_v33 = vpop.permute.xlu1 %2601 }
0x280b   :  { %v2606_v35 = vmul.f32 %v3767_v32, %v2602_v33  ;;  %v2600_v36 = vpop.permute.xlu0 %2599 }
0x280c   :  { %v2605_v37 = vmul.f32 %v3769_v34, %v2600_v36 }
0x280d   :  { %2611 = vrot.lane.b32.xlu1 %v2606_v35, %s3782_s2 }
0x280e   :  { %2609 = vrot.lane.b32.xlu0 %v2605_v37, %s3782_s2 }
0x287f   :  { %v2612_v39 = vpop.permute.xlu1 %2611 }
0x2880   :  { %v2616_v41 = vadd.f32 %v2612_v39, %v2596_v38  ;;  %v2610_v42 = vpop.permute.xlu0 %2609 }
0x2881   :  { %v2615_v29 = vadd.f32 %v2610_v42, %v2595_v40 }
0x2882   :  { %3770 = vtanh.f32 %v2616_v41 }
0x2883   :  { %3772 = vtanh.f32 %v2615_v29 }
0x288c   :  { %v3771_v43 = vpop.eup %3770 }
0x288d   :  { %v3773_v44 = vpop.eup %3772  ;;  %2623 = vrot.lane.b32.xlu1 %v3771_v43, %s3783_s29 }
0x288e   :  { %2621 = vrot.lane.b32.xlu0 %v3773_v44, %s3783_s29 }
0x28ff   :  { %v2624_v45 = vpop.permute.xlu1 %2623 }
0x2900   :  { %v2628_v46 = vmul.f32 %v3767_v32, %v2624_v45  ;;  %v2622_v47 = vpop.permute.xlu0 %2621 }
0x2901   :  { %v2627_v48 = vmul.f32 %v3769_v34, %v2622_v47 }
0x2902   :  { %2634 = vrot.lane.b32.xlu1 %v2628_v46, %s3782_s2 }
0x2903   :  { %2632 = vrot.lane.b32.xlu0 %v2627_v48, %s3782_s2 }
0x2974   :  { %v2635_v50 = vpop.permute.xlu1 %2634 }
0x2975   :  { %v2633_v49 = vpop.permute.xlu0 %2632 }
0x2976   :  { %3306 = vmatprep.mubr.msk.f32.mxu1 %vm283_vm1, %v2633_v49 }
0x2977   :  { %3307 = vmatmul.mubr.msk.f32.vlgmr.msra.gmra.mrb[14].mxu1 %vm283_vm1, %v2635_v50 }
0x2a4a   :  { %v3308_v51 = vpop.f32.mrb[14].mxu1 }
0x2a4b   :  { %v2706_v52 = vpop.f32.mrb[15].mxu1 }
0x2a4c   :  { %v3496_v53 = vadd.f32 %v4168_v5, %v2706_v52  ;;  %v2739_v5 = vld [vmem:[%s4318_s9] sm:$0xff] }
0x2a4d   :  { %v3461_v4 = vpack.c.bf16 %v2740_v1, %v2739_v5 }
0x2a4e   :  { %3774 = vtanh.f32 %v3496_v53  ;;  %v2931_v55 = vmul.f32 -1.442695, %v3496_v53 }
0x2a4f   :  { %3462 = vmatpush3.bf16.msra.mxu0 %v3461_v4 }
0x2a50   :  { %3776 = vpow2.f32 %v2931_v55  ;;  %3463 = vmatprep.subr.bf16.mxu0 %v3784_v0 }
0x2a53   :  { %3465 = vmatpush3.bf16.msra.mxu0 %v3464_v8 }
0x2a58   :  { %v3775_v54 = vpop.eup %3774 }
0x2a59   :  { %2724 = vrot.lane.b32.xlu0 %v3775_v54, %s3783_s29 }
0x2a5a   :  { %v3777_v57 = vpop.eup %3776 }
0x2a5b   :  { %v2718_v59 = vadd.f32 1.0, %v3777_v57 }
0x2a5d   :  { %3778 = vrcp.f32 %v2718_v59 }
0x2a67   :  { %v3779_v60 = vpop.eup %3778 }
0x2a68   :  { %v2722_v63 = vmul.f32 %v3779_v60, %v2615_v29 }
0x2acb   :  { %v2725_v61 = vpop.permute.xlu0 %2724 }
0x2acc   :  { %v2727_v62 = vmul.f32 %v3779_v60, %v2725_v61 }
0x2ace   :  { %2729 = vrot.lane.b32.xlu1 %v2727_v62, %s3782_s2 }
0x2b40   :  { %v2730_v6 = vpop.permute.xlu1 %2729 }
0x2b41   :  { %v2732_v11 = vadd.f32 %v2730_v6, %v2722_v63 }
0x2b43   :  { %3780 = vtanh.f32 %v2732_v11 }
0x2b4d   :  { %v3781_v9 = vpop.eup %3780 }
0x2b4e   :  { %2735 = vrot.lane.b32.xlu0 %v3781_v9, %s3783_s29 }
0x2bc0   :  { %v2736_v10 = vpop.permute.xlu0 %2735 }
0x2bc1   :  { %v2738_v12 = vmul.f32 %v3779_v60, %v2736_v10 }
0x2bc3   :  { %2751 = vrot.lane.b32.xlu1 %v2738_v12, %s3782_s2 }
0x2c35   :  { %v2752_v13 = vpop.permute.xlu1 %2751 }
0x2c36   :  { %3318 = vmatmul.mubr.msk.f32.vlgmr.msra.gmra.mrb[16].mxu0 %vm283_vm1, %v2752_v13 }
0x2d09   :  { %v2821_v15 = vpop.f32.mrb[16].mxu0 }
0x2d0a   :  { %v2822_v16 = vadd.f32 %v2932_v14, %v2821_v15  ;;  %v3319_v17 = vpop.f32.mrb[17].mxu0 }
0x2d0c   :  { %2826 = vst.msk [vmem:[%s4320_s11] sm:$0xff] %vm2825_vm3, %v2822_v16 }

</bundles_post_ra>
